<compile_context>
chip_gen: v7x
topology: tpu7x:2x2x1
jax: 0.10.0
libtpu: 0.0.40
codegen_flags: <defaults>
</compile_context>

<pallas_src>
import functools

import jax
import jax.numpy as jnp
import numpy as np
from jax import lax
from jax.experimental import pallas as pl
from jax.experimental.pallas import tpu as pltpu


def _round_up(x, m):
    return ((x + m - 1) // m) * m


def _cdiv(a, b):
    return -(-a // b)


def _tpu_vmem_bytes():
    try:
        return int(pltpu.get_tpu_info().vmem_capacity_bytes)
    except Exception:
        return 64 * 1024 * 1024


def _default_block_rows():
    """Generation-aware default flat-row tile size."""
    try:
        kind = jax.devices()[0].device_kind.lower()
    except Exception:
        kind = ""
    if "v6" in kind:
        return 1536        # 128 MiB VMEM: bigger tile shrinks halo/step overhead
    if "v5" in kind:
        return 512         # single vst slot / slower MXU: keep the tile modest
    return 768             # v7x / unknown (64 MiB VMEM part)


def _rpn_head_kernel(xc_ref, xh_ref, wconv_ref, bconv_ref, whead_ref,
                     bhead_ref, out_ref, *, shifts):
    """One grid step = one (image, row-tile) pair.

    xc_ref    : (1, TR, C)       bf16  flat padded-feature rows [t*TR, (t+1)*TR)
    xh_ref    : (1, 1, HALO, C)  bf16  halo rows [(t+1)*TR, (t+1)*TR + HALO)
    wconv_ref : (9C, C)          bf16  3x3 conv weights, row block k = tap dy*3+dx
    bconv_ref : (1, C)           f32
    whead_ref : (C, HP)          bf16  fused [cls | bbox | zero-pad] 1x1 heads
    bhead_ref : (1, HP)          f32
    out_ref   : (1, TR, HP)      bf16  fused, lane-dense (HP % 128 == 0) output
    """
    tr = xc_ref.shape[1]

    # bf16 staging of exactly TR + HALO rows (current tile + 3x3 halo).
    xs = jnp.concatenate([xc_ref[0], xh_ref[0, 0]], axis=0)

    # Gather the 9 row-shifted tap views into one (TR, 9C) operand so the whole
    # 3x3 conv is a single K=9C MXU matmul: accumulation stays inside the MXU,
    # no per-tap VMEM read-modify-write, one result drain.
    big = jnp.concatenate([xs[s:s + tr, :] for s in shifts], axis=1)
    conv = jnp.dot(big, wconv_ref[...], preferred_element_type=jnp.float32)

    # Bias + ReLU once per tile, f32 on the VPU.
    t = jnp.maximum(conv + bconv_ref[...], 0.0)

    # Fused cls/bbox 1x1 heads: one lane-dense (TR, HP) matmul, stored as bf16.
    head = (jnp.dot(t.astype(jnp.bfloat16), whead_ref[...],
                    preferred_element_type=jnp.float32) + bhead_ref[...])
    out_ref[0] = head.astype(out_ref.dtype)


@functools.partial(jax.jit, static_argnames=("num_anchors", "block_rows"))
def _rpn_head_single_level(feature_nchw, params, *, num_anchors, block_rows):
    """RPN head on one NCHW feature map -> (cls_logits, bbox_pred), both NCHW."""
    N, C, H, W = feature_nchw.shape
    A = num_anchors
    HP = params["w_heads"].shape[1]          # lane-padded fused head width
    Wp = W + 2                               # padded row width

    # Flattened-spatial trick: padded-feature row r = y*Wp + x.  The conv
    # output at (h, w) needs padded rows q + dy*Wp + dx with q = h*Wp + w, i.e.
    # *uniform row shifts* per tap.  We compute W+2 outputs per image row (the
    # last 2 per row are garbage and dropped in the wrapper).
    R = H * Wp                               # flat output rows per image
    s_max = 2 * Wp + 2                       # largest tap shift
    HALO = _round_up(s_max, 16)              # bf16 sublane packing: 16-aligned

    TR = min(_round_up(block_rows, 16), _round_up(R, 16))
    TR = max(TR, HALO)                       # keep the halo fraction sane
    numT = _cdiv(R, TR)
    LEN = numT * TR + HALO                   # flat rows the kernel may read

    # NCHW -> NHWC bf16, single fused zero-pad: 1 row/col of conv padding plus
    # enough extra bottom rows that the flattened grid covers LEN rows.
    x = jnp.transpose(feature_nchw, (0, 2, 3, 1)).astype(jnp.bfloat16)
    extra_h = max(_cdiv(LEN, Wp) - (H + 2), 0)
    xpad = jnp.pad(x, ((0, 0), (1, 1 + extra_h), (1, 1), (0, 0)))
    xflat = xpad.reshape(N, -1, C)           # (N, >= LEN, C)

    # Pre-gathered per-tile halo rows: tile t needs rows [(t+1)*TR, (t+1)*TR+HALO).
    rows = (TR * (1 + jnp.arange(numT, dtype=jnp.int32))[:, None]
            + jnp.arange(HALO, dtype=jnp.int32)[None, :])
    halo = xflat[:, rows, :]                 # (N, numT, HALO, C)

    shifts = tuple(dy * Wp + dx for dy in range(3) for dx in range(3))
    kernel = functools.partial(_rpn_head_kernel, shifts=shifts)

    flops = 2 * N * numT * TR * C * (9 * C + HP)
    bytes_accessed = (N * numT * (TR + HALO) * C * 2       # bf16 inputs
                      + N * numT * TR * HP * 2             # bf16 head output
                      + (9 * C * C + C * HP) * 2 + (C + HP) * 4)

    # VMEM: double-buffered blocks/weights + the real in-kernel temporaries.
    vmem_need = (2 * (TR + HALO) * C * 2                    # input blocks (x2 bufs)
                 + 2 * TR * HP * 2                          # output block (x2 bufs)
                 + 2 * ((9 * C * C + C * HP) * 2 + (C + HP) * 4)  # weights/biases
                 + (TR + HALO) * C * 2                      # xs staging
                 + TR * 9 * C * 2                           # fused (TR, 9C) operand
                 + 2 * TR * C * 4 + TR * C * 2              # conv/ReLU f32 + bf16 copy
                 + TR * HP * 4)                             # head f32 before cast
    phys = _tpu_vmem_bytes()
    cap = 48 * 1024 * 1024 if phys <= 64 * 1024 * 1024 else 112 * 1024 * 1024
    vmem_limit = int(min(cap, max(32 * 1024 * 1024, int(1.5 * vmem_need))))

    out = pl.pallas_call(
        kernel,
        out_shape=jax.ShapeDtypeStruct((N, numT * TR, HP), jnp.bfloat16),
        grid_spec=pltpu.PrefetchScalarGridSpec(
            num_scalar_prefetch=0,
            grid=(N, numT),
            in_specs=[
                pl.BlockSpec((1, TR, C), lambda n, t: (n, t, 0)),          # rows
                pl.BlockSpec((1, 1, HALO, C), lambda n, t: (n, t, 0, 0)),  # halo
                # TODO(synk): single-buffer these grid-invariant operands
                # (pipeline_mode=pl.Buffered(1)) to save ~1 MiB VMEM at C=256.
                pl.BlockSpec((9 * C, C), lambda n, t: (0, 0)),
                pl.BlockSpec((1, C),     lambda n, t: (0, 0)),
                pl.BlockSpec((C, HP),    lambda n, t: (0, 0)),
                pl.BlockSpec((1, HP),    lambda n, t: (0, 0)),
            ],
            out_specs=pl.BlockSpec((1, TR, HP), lambda n, t: (n, t, 0)),
        ),
        compiler_params=pltpu.CompilerParams(
            dimension_semantics=("parallel", "parallel"),
            vmem_limit_bytes=vmem_limit),
        cost_estimate=pl.CostEstimate(flops=flops, transcendentals=0,
                                      bytes_accessed=bytes_accessed),
    )(xflat, halo, params["w_conv"], params["b_conv"],
      params["w_heads"], params["b_heads"])

    # Drop padded tail rows and the 2 garbage columns per image row, split the
    # fused lane-dense output into cls / bbox, upcast, and go back to NCHW.
    out = out[:, :R, :].reshape(N, H, Wp, HP)[:, :, :W, :].astype(jnp.float32)
    cls = jnp.transpose(out[..., :A], (0, 3, 1, 2))
    box = jnp.transpose(out[..., A:5 * A], (0, 3, 1, 2))
    return cls, box


def rpn_head_forward(features, params, *, block_rows=None):
    """Matches RPNHead.forward: list of features -> (list logits, list bbox)."""
    A = params["num_anchors"]
    br = int(block_rows) if block_rows else _default_block_rows()
    arr_params = {k: v for k, v in params.items() if k != "num_anchors"}
    logits, bbox_reg = [], []
    for feat in features:
        c, b = _rpn_head_single_level(feat, arr_params, num_anchors=A,
                                      block_rows=br)
        logits.append(c)
        bbox_reg.append(b)
    return logits, bbox_reg


def init_rpn_params(key, in_channels, num_anchors):
    """Deterministic init: normal(std=0.01) weights, zero bias (as in __init__)."""
    C, A = in_channels, num_anchors
    k1, k2, k3 = jax.random.split(key, 3)
    # PyTorch layouts: conv weights are (Cout, Cin, kh, kw).
    w_conv_t = 0.01 * jax.random.normal(k1, (C, C, 3, 3), jnp.float32)
    w_cls_t = 0.01 * jax.random.normal(k2, (A, C, 1, 1), jnp.float32)
    w_box_t = 0.01 * jax.random.normal(k3, (A * 4, C, 1, 1), jnp.float32)

    HP = _round_up(5 * A, 128)               # lane-dense fused head width
    # (kh, kw, Cin, Cout) -> (9*Cin, Cout); row block k = dy*3 + dx matches the
    # in-kernel shift order s_k = dy*Wp + dx.
    w_conv = jnp.transpose(w_conv_t, (2, 3, 1, 0)).reshape(9 * C, C)
    # Fused [cls | bbox] 1x1 heads, zero-padded to HP output lanes.
    w_heads = jnp.concatenate(
        [jnp.transpose(w_cls_t[:, :, 0, 0], (1, 0)),
         jnp.transpose(w_box_t[:, :, 0, 0], (1, 0))], axis=1)
    w_heads = jnp.pad(w_heads, ((0, 0), (0, HP - 5 * A)))

    params = {
        "w_conv": w_conv.astype(jnp.bfloat16),
        "b_conv": jnp.zeros((1, C), jnp.float32),
        "w_heads": w_heads.astype(jnp.bfloat16),
        "b_heads": jnp.zeros((1, HP), jnp.float32),
        "num_anchors": A,
    }
    torch_layout = {"w_conv": w_conv_t, "w_cls": w_cls_t, "w_box": w_box_t}
    return params, torch_layout


def _reference_forward(features, torch_w):
    """Pure-JAX f32 NCHW reference (mirrors the PyTorch forward)."""
    dn = ("NCHW", "OIHW", "NCHW")
    logits, bbox_reg = [], []
    for f in features:
        t = lax.conv_general_dilated(f, torch_w["w_conv"], (1, 1),
                                     ((1, 1), (1, 1)), dimension_numbers=dn)
        t = jnp.maximum(t, 0.0)
        c = lax.conv_general_dilated(t, torch_w["w_cls"], (1, 1),
                                     ((0, 0), (0, 0)), dimension_numbers=dn)
        b = lax.conv_general_dilated(t, torch_w["w_box"], (1, 1),
                                     ((0, 0), (0, 0)), dimension_numbers=dn)
        logits.append(c)
        bbox_reg.append(b)
    return logits, bbox_reg


if __name__ == "__main__":
    in_channels = 4
    num_anchors = 3

    key = jax.random.PRNGKey(0)
    kp, kf0, kf1 = jax.random.split(key, 3)

    params, torch_w = init_rpn_params(kp, in_channels, num_anchors)

    # Two-level feature pyramid, NCHW (as the PyTorch module expects).
    features = [
        jax.random.normal(kf0, (2, in_channels, 16, 16), jnp.float32),
        jax.random.normal(kf1, (2, in_channels, 8, 8), jnp.float32),
    ]

    ref_logits, ref_bbox = _reference_forward(features, torch_w)

    # Run once with the generation-aware default tile (single tile per image at
    # these toy shapes) and once with a small tile to exercise the multi-tile
    # halo path.  Tolerances are loosened for the intentional bf16 compute.
    for br in (None, 64):
        logits, bbox_reg = rpn_head_forward(features, params, block_rows=br)
        jax.block_until_ready(logits)
        jax.block_until_ready(bbox_reg)
        for got, ref in zip(logits + bbox_reg, ref_logits + ref_bbox):
            assert got.shape == ref.shape, (got.shape, ref.shape)
            np.testing.assert_allclose(np.asarray(got), np.asarray(ref),
                                       rtol=2e-2, atol=1e-3)

    print("KERNEL_OK")
</pallas_src>

<mosaic_0001>
module attributes {stable_mosaic.version = 11 : i64} {
  func.func @_rpn_head_kernel(%arg0: i32, %arg1: i32, %arg2: memref<1x288x4xbf16, #tpu.memory_space<vmem>>, %arg3: memref<1x1x48x4xbf16, #tpu.memory_space<vmem>>, %arg4: memref<36x4xbf16, #tpu.memory_space<vmem>>, %arg5: memref<1x4xf32, #tpu.memory_space<vmem>>, %arg6: memref<4x128xbf16, #tpu.memory_space<vmem>>, %arg7: memref<1x128xf32, #tpu.memory_space<vmem>>, %arg8: memref<1x288x128xbf16, #tpu.memory_space<vmem>>) attributes {dimension_semantics = [#tpu.dimension_semantics<parallel>, #tpu.dimension_semantics<parallel>], iteration_bounds = array<i64: 2, 1>, scalar_prefetch = 0 : i64, scratch_operands = 0 : i64, tpu.core_type = #tpu.core_type<tc>, window_params = [{transform_indices = @transform_0, window_bounds = array<i64: 1, 288, 4>}, {transform_indices = @transform_1, window_bounds = array<i64: 1, 1, 48, 4>}, {pipeline_mode = #tpu.pipeline_mode<synchronous>, transform_indices = @transform_2, window_bounds = array<i64: 36, 4>}, {pipeline_mode = #tpu.pipeline_mode<synchronous>, transform_indices = @transform_3, window_bounds = array<i64: 1, 4>}, {pipeline_mode = #tpu.pipeline_mode<synchronous>, transform_indices = @transform_4, window_bounds = array<i64: 4, 128>}, {pipeline_mode = #tpu.pipeline_mode<synchronous>, transform_indices = @transform_5, window_bounds = array<i64: 1, 128>}, {transform_indices = @transform_6, window_bounds = array<i64: 1, 288, 128>}]} {
    %c0 = arith.constant 0 : index
    %c0_0 = arith.constant 0 : index
    %c0_1 = arith.constant 0 : index
    %0 = vector.load %arg2[%c0, %c0_0, %c0_1] : memref<1x288x4xbf16, #tpu.memory_space<vmem>>, vector<1x288x4xbf16>
    %1 = vector.shape_cast %0 : vector<1x288x4xbf16> to vector<288x4xbf16>
    %c0_2 = arith.constant 0 : index
    %c0_3 = arith.constant 0 : index
    %c0_4 = arith.constant 0 : index
    %c0_5 = arith.constant 0 : index
    %2 = vector.load %arg3[%c0_2, %c0_3, %c0_4, %c0_5] : memref<1x1x48x4xbf16, #tpu.memory_space<vmem>>, vector<1x1x48x4xbf16>
    %3 = vector.shape_cast %2 : vector<1x1x48x4xbf16> to vector<48x4xbf16>
    %4 = tpu.concatenate %1, %3 in 0 : vector<288x4xbf16>, vector<48x4xbf16> -> vector<336x4xbf16>
    %5 = vector.extract_strided_slice %4 {offsets = [0, 0], sizes = [288, 4], strides = [1, 1]} : vector<336x4xbf16> to vector<288x4xbf16>
    %6 = vector.extract_strided_slice %4 {offsets = [1, 0], sizes = [288, 4], strides = [1, 1]} : vector<336x4xbf16> to vector<288x4xbf16>
    %7 = vector.extract_strided_slice %4 {offsets = [2, 0], sizes = [288, 4], strides = [1, 1]} : vector<336x4xbf16> to vector<288x4xbf16>
    %8 = vector.extract_strided_slice %4 {offsets = [18, 0], sizes = [288, 4], strides = [1, 1]} : vector<336x4xbf16> to vector<288x4xbf16>
    %9 = vector.extract_strided_slice %4 {offsets = [19, 0], sizes = [288, 4], strides = [1, 1]} : vector<336x4xbf16> to vector<288x4xbf16>
    %10 = vector.extract_strided_slice %4 {offsets = [20, 0], sizes = [288, 4], strides = [1, 1]} : vector<336x4xbf16> to vector<288x4xbf16>
    %11 = vector.extract_strided_slice %4 {offsets = [36, 0], sizes = [288, 4], strides = [1, 1]} : vector<336x4xbf16> to vector<288x4xbf16>
    %12 = vector.extract_strided_slice %4 {offsets = [37, 0], sizes = [288, 4], strides = [1, 1]} : vector<336x4xbf16> to vector<288x4xbf16>
    %13 = vector.extract_strided_slice %4 {offsets = [38, 0], sizes = [288, 4], strides = [1, 1]} : vector<336x4xbf16> to vector<288x4xbf16>
    %14 = tpu.concatenate %5, %6, %7, %8, %9, %10, %11, %12, %13 in 1 : vector<288x4xbf16>, vector<288x4xbf16>, vector<288x4xbf16>, vector<288x4xbf16>, vector<288x4xbf16>, vector<288x4xbf16>, vector<288x4xbf16>, vector<288x4xbf16>, vector<288x4xbf16> -> vector<288x36xbf16>
    %c0_6 = arith.constant 0 : index
    %c0_7 = arith.constant 0 : index
    %15 = vector.load %arg4[%c0_6, %c0_7] : memref<36x4xbf16, #tpu.memory_space<vmem>>, vector<36x4xbf16>
    %cst = arith.constant dense<0.000000e+00> : vector<288x4xf32>
    %16 = tpu.matmul %14, %15, %cst {dimension_numbers = #tpu.dot_dimension_numbers<[1], [0], [0], [1], [0, 0, 1, 1], [], []>} : vector<288x36xbf16>, vector<36x4xbf16>, vector<288x4xf32> -> vector<288x4xf32>
    %c0_8 = arith.constant 0 : index
    %c0_9 = arith.constant 0 : index
    %17 = vector.load %arg5[%c0_8, %c0_9] : memref<1x4xf32, #tpu.memory_space<vmem>>, vector<1x4xf32>
    %18 = vector.broadcast %17 : vector<1x4xf32> to vector<288x4xf32>
    %19 = arith.addf %16, %18 : vector<288x4xf32>
    %cst_10 = arith.constant 0.000000e+00 : f32
    %20 = vector.broadcast %cst_10 : f32 to vector<288x4xf32>
    %21 = arith.maximumf %19, %20 : vector<288x4xf32>
    %22 = arith.truncf %21 : vector<288x4xf32> to vector<288x4xbf16>
    %c0_11 = arith.constant 0 : index
    %c0_12 = arith.constant 0 : index
    %23 = vector.load %arg6[%c0_11, %c0_12] : memref<4x128xbf16, #tpu.memory_space<vmem>>, vector<4x128xbf16>
    %cst_13 = arith.constant dense<0.000000e+00> : vector<288x128xf32>
    %24 = tpu.matmul %22, %23, %cst_13 {dimension_numbers = #tpu.dot_dimension_numbers<[1], [0], [0], [1], [0, 0, 1, 1], [], []>} : vector<288x4xbf16>, vector<4x128xbf16>, vector<288x128xf32> -> vector<288x128xf32>
    %c0_14 = arith.constant 0 : index
    %c0_15 = arith.constant 0 : index
    %25 = vector.load %arg7[%c0_14, %c0_15] : memref<1x128xf32, #tpu.memory_space<vmem>>, vector<1x128xf32>
    %26 = vector.broadcast %25 : vector<1x128xf32> to vector<288x128xf32>
    %27 = arith.addf %24, %26 : vector<288x128xf32>
    %28 = arith.truncf %27 : vector<288x128xf32> to vector<288x128xbf16>
    %c0_16 = arith.constant 0 : index
    %c0_17 = arith.constant 0 : index
    %c0_18 = arith.constant 0 : index
    %29 = vector.load %arg8[%c0_16, %c0_17, %c0_18] : memref<1x288x128xbf16, #tpu.memory_space<vmem>>, vector<1x288x128xbf16>
    %30 = vector.shape_cast %29 : vector<1x288x128xbf16> to vector<288x128xbf16>
    %31 = vector.shape_cast %28 : vector<288x128xbf16> to vector<1x288x128xbf16>
    tpu.vector_store %arg8[%c0_16, %c0_17, %c0_18], %31 {strides = array<i32>} : memref<1x288x128xbf16, #tpu.memory_space<vmem>>, vector<1x288x128xbf16>,
    return
  }
  func.func @transform_0(%arg0: i32, %arg1: i32) -> (i32, i32, i32) {
    %c0_i32 = arith.constant 0 : i32
    %c0_i32_0 = arith.constant 0 : i32
    return %arg0, %arg1, %c0_i32 : i32, i32, i32
  }
  func.func @transform_1(%arg0: i32, %arg1: i32) -> (i32, i32, i32, i32) {
    %c0_i32 = arith.constant 0 : i32
    %c0_i32_0 = arith.constant 0 : i32
    %c0_i32_1 = arith.constant 0 : i32
    return %arg0, %arg1, %c0_i32, %c0_i32_0 : i32, i32, i32, i32
  }
  func.func @transform_2(%arg0: i32, %arg1: i32) -> (i32, i32) {
    %c0_i32 = arith.constant 0 : i32
    %c0_i32_0 = arith.constant 0 : i32
    %c0_i32_1 = arith.constant 0 : i32
    return %c0_i32, %c0_i32_0 : i32, i32
  }
  func.func @transform_3(%arg0: i32, %arg1: i32) -> (i32, i32) {
    %c0_i32 = arith.constant 0 : i32
    %c0_i32_0 = arith.constant 0 : i32
    %c0_i32_1 = arith.constant 0 : i32
    return %c0_i32, %c0_i32_0 : i32, i32
  }
  func.func @transform_4(%arg0: i32, %arg1: i32) -> (i32, i32) {
    %c0_i32 = arith.constant 0 : i32
    %c0_i32_0 = arith.constant 0 : i32
    %c0_i32_1 = arith.constant 0 : i32
    return %c0_i32, %c0_i32_0 : i32, i32
  }
  func.func @transform_5(%arg0: i32, %arg1: i32) -> (i32, i32) {
    %c0_i32 = arith.constant 0 : i32
    %c0_i32_0 = arith.constant 0 : i32
    %c0_i32_1 = arith.constant 0 : i32
    return %c0_i32, %c0_i32_0 : i32, i32
  }
  func.func @transform_6(%arg0: i32, %arg1: i32) -> (i32, i32, i32) {
    %c0_i32 = arith.constant 0 : i32
    %c0_i32_0 = arith.constant 0 : i32
    return %arg0, %arg1, %c0_i32 : i32, i32, i32
  }
}

</mosaic_0001>

<bundles_post_ra>
// kernel: _rpn_head_single_level.1
= control target key start
LH: loop header
LB: loop body
LE: loop exit
PB: predicated region body
PF: predicated region fallthrough
CT: control target
= control target key end

     0   :  { %s2837_s21 = smov 0   ;;  %s2839_s22 = smov 0   ;;  %s3955_s0 = inlined_call_operand.vmem [shape: bf16[2,342,4], index: 0, kind: input, shape index: {}]   ;;  %s3956_s1 = inlined_call_operand.vmem [shape: bf16[2,1,48,4], index: 1, kind: input, shape index: {}]   ;;  %s3957_s2 = inlined_call_operand.vmem [shape: bf16[36,4], index: 2, kind: input, shape index: {}]   ;;  %s3958_s3 = inlined_call_operand.vmem [shape: f32[1,4], index: 3, kind: input, shape index: {}]   ;;  %s3959_s4 = inlined_call_operand.vmem [shape: bf16[4,128], index: 4, kind: input, shape index: {}]   ;;  %s3960_s5 = inlined_call_operand.vmem [shape: f32[1,128], index: 5, kind: input, shape index: {}]   ;;  %s3961_s6 = inlined_call_operand.vmem [shape: bf16[2,288,128], index: 6, kind: output, shape index: {}]  }
   0x1   :  { %s2841_s23 = smov 0  }
   0x2 LB: > { %s28_s24 = sadd.s32 1, %s2788_s22  ;;  %p2341_p0 = scmp.ge.s32.totalorder %s2792_s23, 1  ;;  %s2792_s23 = sphi %s2841_s23, %s16_s23   ;;  %s2788_s22 = sphi %s2839_s22, %s3963_s22   ;;  %s2784_s21 = sphi %s2837_s21, %s3962_s21  }
   0x3   : > { %p30_p1 = scmp.ge.s32.totalorder %s28_s24, 2  ;;  %p257_p2 = scmp.lt.s32.totalorder %s2792_s23, 3 }
   0x5   : > { %s3965_s24 = smov (%p30_p1, %s28_s24), 0  ;;  %p258_p3 = pnand %p2341_p0, %p257_p2 }
   0x6   : > { %p313_p4 = scmp.lt.s32.totalorder (!%p258_p3), %s2784_s21, 1  ;;  %vm678_vm0 = vcmask (!%p258_p3), 1046528   ;;  %vm909_vm1 = vcmask (!%p258_p3), 1045504   ;;  %vm493_vm2 = vsmask.f32 (!%p258_p3), 7424  ;;  %s2794_s29 = smov (!%p258_p3), 12  }
   0x7   : > { %261 = sbr.rel (%p258_p3) target bundleno = 865 (0x361), region = 44  ;;  %s2795_s30 = smov (!%p258_p3), 8   ;;  %v2756_v36 = vld [vmem:[%s3957_s2] sm:$0xff] (!%p258_p3)   ;;  %vm790_vm3 = vsmask.f32 (!%p258_p3), 6400  ;;  %v2758_v44 = vld [vmem:[%s3957_s2 + $0x8] sm:$0xff] (!%p258_p3)  }
   0x8   : > { %s2796_s7 = smov (!%p258_p3), 20   ;;  %s2797_s8 = smov (!%p258_p3), 4   ;;  %2628 = vmatprep.subr.bf16.mxu0 (!%p258_p3), %v2756_v36  ;;  %vm1021_vm4 = vsmask.f32 (!%p258_p3), 5376  ;;  %vm1138_vm5 = vcmask (!%p258_p3), 1044480   ;;  %vm1572_vm6 = vcmask (!%p258_p3), 1041408  }
   0x9   : > { %2629 = vmatpush3.bf16.msra.mxu0 (!%p258_p3), %v2756_v36  ;;  %s2798_s13 = smov (!%p258_p3), 16   ;;  %s2799_s14 = smov (!%p258_p3), 24   ;;  %vm1212_vm7 = vcmask (!%p258_p3), 31744   ;;  %vm1249_vm8 = vcmask (!%p258_p3), 64512   ;;  %vm1286_vm9 = vcmask (!%p258_p3), 97280   ;;  %vm1323_vm10 = vcmask (!%p258_p3), 130048  }
   0xa   : > { %2630 = vmatprep.subr.bf16.mxu0 (!%p258_p3), %v2758_v44  ;;  %s2800_s15 = smov (!%p258_p3), 28   ;;  %s2801_s16 = smov (!%p258_p3), 32   ;;  %vm1360_vm11 = vcmask (!%p258_p3), 162816   ;;  %vm1397_vm12 = vcmask (!%p258_p3), 195584   ;;  %vm1434_vm13 = vcmask (!%p258_p3), 228352   ;;  %vm1471_vm14 = vcmask (!%p258_p3), 261120  }
   0xb   : > { %vm1535_vm15 = vcmask (!%p258_p3), 293888  }
   0xd   : > { %2631 = vmatpush3.bf16.msra.mxu0 (!%p258_p3), %v2758_v44 }
   0xe   : > { %s3967_s21 = smov (!%p313_p4, %s2784_s21), 1 }
   0xf   : > { %s2710_s25 = smul.u32 172, %s3967_s21 }
  0x10   : > { %s2711_s19 = smul.u32 24, %s3967_s21 }
  0x11   : > { %s2861_s28 = scalar_lea.vmem %s3955_s0, %s2710_s25 }
  0x12   : > { %v2864_v0 = vld [vmem:[%s2861_s28 + $0x8] sm:$0xff]   ;;  %v2867_v1 = vld [vmem:[%s2861_s28 + $0x10] sm:$0xff]   ;;  %v2870_v2 = vld [vmem:[%s2861_s28] sm:$0xff]   ;;  %s3155_s26 = scalar_lea.vmem %s3956_s1, %s2711_s19 }
  0x13   : > { %v680_v3 = vrot.slane %v2864_v0, 1  ;;  %v682_v4 = vrot.slane %v2867_v1, 1  ;;  %v910_v5 = vrot.slane %v2864_v0, 2  ;;  %v911_v6 = vrot.slane %v2867_v1, 2  ;;  %v2878_v8 = vld [vmem:[%s2861_s28 + $0x18] sm:$0xff]   ;;  %v2917_v35 = vld [vmem:[%s2861_s28 + $0x20] sm:$0xff]  }
  0x14   : > { %v679_v7 = vrot.slane %v2870_v2, 1  ;;  %v495_v9 = vshrl.u32 %v2870_v2, 16  ;;  %v497_v10 = vshll.u32 %v2870_v2, 16  ;;  %v502_v12 = vshll.u32 %v2864_v0, 16 }
  0x15   : > { %v683_v11 = vsel %vm678_vm0, %v680_v3, %v682_v4  ;;  %v912_v14 = vsel %vm909_vm1, %v910_v5, %v911_v6  ;;  %v506_v16 = vshrl.u32 %v2864_v0, 16  ;;  %v684_v17 = vrot.slane %v2878_v8, 1 }
  0x16   : > { %754 = vrot.lane.b32.xlu0 %v683_v11, %s2794_s29  ;;  %v681_v13 = vsel %vm678_vm0, %v679_v7, %v680_v3  ;;  %v499_v15 = vrot.slane %v497_v10, 1  ;;  %v504_v18 = vrot.slane %v502_v12, 1  ;;  %v2891_v19 = vshll.u32 %v2867_v1, 16 }
  0x17   : > { %716 = vrot.lane.b32.xlu1 %v681_v13, %s2795_s30  ;;  %v2894_v20 = vshrl.u32 %v2867_v1, 16  ;;  %v2897_v22 = vshll.u32 %v2878_v8, 16  ;;  %v2900_v23 = vshrl.u32 %v2878_v8, 16  ;;  %v791_v29 = vrot.slane %v506_v16, 1 }
  0x18   : > { %v500_v21 = vor.u32 %v499_v15, %v495_v9  ;;  %v512_v24 = vrot.slane %v2891_v19, 1  ;;  %v795_v26 = vrot.slane %v2891_v19, 2  ;;  %v508_v28 = vor.u32 %v506_v16, %v504_v18  ;;  %v2977_v9 = vld [vmem:[%s2861_s28 + $0x28] sm:$0xff]  }
  0x19   : > { %v794_v25 = vrot.slane %v2894_v20, 1  ;;  %v792_v30 = vrot.slane %v502_v12, 2  ;;  %v2911_v31 = vsel %vm678_vm0, %v682_v4, %v684_v17  ;;  %v913_v32 = vrot.slane %v2878_v8, 2 }
  0x1a   : > { %947 = vrot.lane.b32.xlu0 %v912_v14, %s2796_s7  ;;  %v505_v27 = vsel %vm493_vm2, %v500_v21, %v504_v18  ;;  %v798_v33 = vrot.slane %v2900_v23, 1  ;;  %v799_v34 = vrot.slane %v2897_v22, 2  ;;  %v513_v37 = vsel %vm493_vm2, %v508_v28, %v512_v24 }
  0x1b   : > { %718 = vrot.lane.b32.xlu1 %v683_v11, %s2795_s30  ;;  %v796_v38 = vor.u32 %v795_v26, %v794_v25  ;;  %v793_v39 = vor.u32 %v792_v30, %v791_v29  ;;  %v914_v40 = vsel %vm909_vm1, %v911_v6, %v913_v32  ;;  %v2930_v42 = vshll.u32 %v2917_v35, 16  ;;  %v3001_v25 = vld [vmem:[%s2861_s28 + $0x30] sm:$0xff]  }
  0x1c   : > { %v2927_v41 = vor.u32 %v799_v34, %v798_v33  ;;  %v2933_v43 = vshrl.u32 %v2917_v35, 16  ;;  %v1025_v45 = vrot.slane %v2900_v23, 2  ;;  %v1026_v46 = vrot.slane %v2897_v22, 3  ;;  %v2759_v26 = vld [vmem:[%s3957_s2 + $0x10] ss:$0 sps:$4 sm:$0x33]  }
  0x1d   : > { %v797_v47 = vsel %vm790_vm3, %v793_v39, %v796_v38  ;;  %v1022_v48 = vrot.slane %v2894_v20, 2  ;;  %v1023_v49 = vrot.slane %v2891_v19, 3  ;;  %v915_v51 = vrot.slane %v2917_v35, 2  ;;  %2708 = vmatprep.subr.msk.bf16.mxu0 %vm1572_vm6, %v2759_v26 }
  0x1e   : > { %642 = vrot.lane.b32.xlu0 %v505_v27, %s2797_s8  ;;  %v801_v50 = vsel %vm790_vm3, %v796_v38, %v2927_v41  ;;  %v1029_v52 = vrot.slane %v2933_v43, 2  ;;  %v1030_v53 = vrot.slane %v2930_v42, 3  ;;  %v1027_v54 = vor.u32 %v1026_v46, %v1025_v45 }
  0x1f   : > { %756 = vrot.lane.b32.xlu1 %v2911_v31, %s2794_s29  ;;  %v1024_v55 = vor.u32 %v1023_v49, %v1022_v48  ;;  %v2955_v56 = vsel %vm909_vm1, %v913_v32, %v915_v51  ;;  %v1139_v59 = vrot.slane %v2867_v1, 3  ;;  %v1140_v60 = vrot.slane %v2878_v8, 3 }
  0x20   : > { %v2957_v57 = vor.u32 %v1030_v53, %v1029_v52  ;;  %v516_v62 = vor.u32 %v2894_v20, %v512_v24  ;;  %v520_v63 = vrot.slane %v2897_v22, 1  ;;  %v1142_v4 = vrot.slane %v2917_v35, 3  ;;  %v3047_v53 = vld [vmem:[%s2861_s28 + $0x38] sm:$0xff]  }
  0x21   : > { %v1028_v58 = vsel %vm1021_vm4, %v1024_v55, %v1027_v54  ;;  %v1141_v3 = vsel %vm1138_vm5, %v1139_v59, %v1140_v60  ;;  %v528_v7 = vrot.slane %v2930_v42, 1  ;;  %v686_v12 = vrot.slane %v2917_v35, 1 }
  0x22   : > { %644 = vrot.lane.b32.xlu0 %v513_v37, %s2797_s8  ;;  %v1032_v61 = vsel %vm1021_vm4, %v1027_v54, %v2957_v57  ;;  %v521_v5 = vsel %vm493_vm2, %v516_v62, %v520_v63  ;;  %v524_v6 = vor.u32 %v2900_v23, %v520_v63  ;;  %v1143_v10 = vsel %vm1138_vm5, %v1140_v60, %v1142_v4 }
  0x23   : > { %949 = vrot.lane.b32.xlu1 %v914_v40, %s2796_s7  ;;  %v534_v13 = vshll.u32 %v2977_v9, 16  ;;  %v538_v14 = vshrl.u32 %v2977_v9, 16  ;;  %v802_v15 = vrot.slane %v2933_v43, 1  ;;  %v803_v16 = vrot.slane %v2930_v42, 2 }
  0x24   : > { %v529_v11 = vsel %vm493_vm2, %v524_v6, %v528_v7  ;;  %v687_v18 = vsel %vm678_vm0, %v684_v17, %v686_v12  ;;  %v688_v19 = vrot.slane %v2977_v9, 1  ;;  %v917_v28 = vrot.slane %v2977_v9, 2  ;;  %v3066_v6 = vld [vmem:[%s2861_s28 + $0x40] sm:$0xff]  }
  0x25   : > { %v806_v20 = vrot.slane %v538_v14, 1  ;;  %v807_v21 = vrot.slane %v534_v13, 2  ;;  %v804_v22 = vor.u32 %v803_v16, %v802_v15  ;;  %v3014_v29 = vshll.u32 %v3001_v25, 16 }
  0x26   : > { %873 = vrot.lane.b32.xlu0 %v797_v47, %s2798_s13  ;;  %v689_v23 = vsel %vm678_vm0, %v686_v12, %v688_v19  ;;  %v3017_v30 = vshrl.u32 %v3001_v25, 16  ;;  %v1033_v32 = vrot.slane %v538_v14, 2  ;;  %v1034_v33 = vrot.slane %v534_v13, 3 }
  0x27   : > { %875 = vrot.lane.b32.xlu1 %v801_v50, %s2798_s13  ;;  %v2998_v24 = vor.u32 %v807_v21, %v806_v20  ;;  %v805_v17 = vsel %vm790_vm3, %v2927_v41, %v804_v22  ;;  %v918_v34 = vsel %vm909_vm1, %v915_v51, %v917_v28  ;;  %v1038_v37 = vrot.slane %v3014_v29, 3 }
  0x28   : > { %v1037_v36 = vrot.slane %v3017_v30, 2  ;;  %v1574_v38 = vsel %vm1572_vm6, %v2759_v26, 0  ;;  %v1035_v39 = vor.u32 %v1034_v33, %v1033_v32  ;;  %v1144_v44 = vrot.slane %v2977_v9, 3 }
  0x29   : > { %v809_v27 = vsel %vm790_vm3, %v804_v22, %v2998_v24  ;;  %2633 = vmatpush3.bf16.msra.mxu0 %v1574_v38  ;;  %v532_v46 = vor.u32 %v2933_v43, %v528_v7  ;;  %v536_v47 = vrot.slane %v534_v13, 1  ;;  %v1146_v49 = vrot.slane %v3001_v25, 3 }
  0x2a   : > { %985 = vrot.lane.b32.xlu0 %v914_v40, %s2799_s14  ;;  %v1039_v41 = vor.u32 %v1038_v37, %v1037_v36  ;;  %v1036_v42 = vsel %vm1021_vm4, %v2957_v57, %v1035_v39  ;;  %v1145_v48 = vsel %vm1138_vm5, %v1142_v4, %v1144_v44  ;;  %v544_v52 = vrot.slane %v3014_v29, 1  ;;  %v3105_v36 = vld [vmem:[%s2861_s28 + $0x48] sm:$0xff]  }
  0x2b   : > { %987 = vrot.lane.b32.xlu1 %v2955_v56, %s2799_s14  ;;  %v537_v50 = vsel %vm493_vm2, %v532_v46, %v536_v47  ;;  %v540_v51 = vor.u32 %v538_v14, %v536_v47  ;;  %v1147_v43 = vsel %vm1138_vm5, %v1144_v44, %v1146_v49  ;;  %v690_v55 = vrot.slane %v3001_v25, 1 }
  0x2c   : > { %v1040_v45 = vsel %vm1021_vm4, %v1035_v39, %v1039_v41  ;;  %v554_v57 = vshrl.u32 %v3047_v53, 16  ;;  %v811_v59 = vrot.slane %v3014_v29, 2  ;;  %v3075_v12 = vshll.u32 %v3066_v6, 16 }
  0x2d   : > { %v545_v54 = vsel %vm493_vm2, %v540_v51, %v544_v52  ;;  %v691_v60 = vsel %vm678_vm0, %v688_v19, %v690_v55  ;;  %v3078_v13 = vshrl.u32 %v3066_v6, 16  ;;  %v694_v38 = vrot.slane %v3066_v6, 1  ;;  %v3130_v51 = vld [vmem:[%s2861_s28 + $0x50] sm:$0xff]  }
  0x2e   : > { %1102 = vrot.lane.b32.xlu0 %v1028_v58, %s2800_s15  ;;  %v810_v58 = vrot.slane %v3017_v30, 1  ;;  %v814_v62 = vrot.slane %v554_v57, 1  ;;  %v1041_v14 = vrot.slane %v554_v57, 2  ;;  %v1046_v20 = vrot.slane %v3075_v12, 3 }
  0x2f   : > { %1104 = vrot.lane.b32.xlu1 %v1032_v61, %s2800_s15  ;;  %v692_v61 = vrot.slane %v3047_v53, 1  ;;  %v1045_v19 = vrot.slane %v3078_v13, 2  ;;  %v566_v39 = vshll.u32 %v3105_v36, 16 }
  0x31   : > { %v693_v4 = vsel %vm678_vm0, %v690_v55, %v692_v61  ;;  %v695_v44 = vsel %vm678_vm0, %v692_v61, %v694_v38  ;;  %v823_v47 = vrot.slane %v566_v39, 2  ;;  %v3140_v55 = vshll.u32 %v3130_v51, 16 }
  0x32   : > { %1176 = vrot.lane.b32.xlu0 %v1141_v3, %s2801_s16  ;;  %v812_v3 = vor.u32 %v811_v59, %v810_v58  ;;  %v1050_v58 = vrot.slane %v566_v39, 3 }
  0x33   : > { %646 = vrot.lane.b32.xlu1 %v521_v5, %s2797_s8 }
  0x34   : > { %v813_v7 = vsel %vm790_vm3, %v2998_v24, %v812_v3 }
  0x36   : > { %1178 = vrot.lane.b32.xlu0 %v1143_v10, %s2801_s16 }
  0x37   : > { %648 = vrot.lane.b32.xlu1 %v529_v11, %s2797_s8  ;;  %v921_v11 = vrot.slane %v3047_v53, 2 }
  0x3a   : > { %720 = vrot.lane.b32.xlu0 %v2911_v31, %s2795_s30  ;;  %v919_v31 = vrot.slane %v3001_v25, 2 }
  0x3b   : > { %722 = vrot.lane.b32.xlu1 %v687_v18, %s2795_s30 }
  0x3c   : > { %v920_v40 = vsel %vm909_vm1, %v917_v28, %v919_v31  ;;  %v922_v16 = vsel %vm909_vm1, %v919_v31, %v921_v11  ;;  %v1150_v31 = vrot.slane %v3066_v6, 3 }
  0x3e   : > { %758 = vrot.lane.b32.xlu0 %v687_v18, %s2794_s29  ;;  %v923_v18 = vrot.slane %v3066_v6, 2 }
  0x3f   : > { %760 = vrot.lane.b32.xlu1 %v689_v23, %s2794_s29 }
  0x40   : > { %v924_v22 = vsel %vm909_vm1, %v921_v11, %v923_v18  ;;  %v1152_v11 = vrot.slane %v3105_v36, 3 }
  0x42   : > { %877 = vrot.lane.b32.xlu0 %v805_v17, %s2798_s13  ;;  %v1148_v17 = vrot.slane %v3047_v53, 3 }
  0x43   : > { %879 = vrot.lane.b32.xlu1 %v809_v27, %s2798_s13  ;;  %v548_v27 = vor.u32 %v3017_v30, %v544_v52 }
  0x44   : > { %v1149_v29 = vsel %vm1138_vm5, %v1146_v49, %v1148_v17  ;;  %v1151_v30 = vsel %vm1138_vm5, %v1148_v17, %v1150_v31  ;;  %v3184_v17 = vld [vmem:[%s2861_s28 + $0x58] sm:$0xff]  }
  0x46   : > { %951 = vrot.lane.b32.xlu0 %v2955_v56, %s2796_s7  ;;  %v550_v56 = vshll.u32 %v3047_v53, 16 }
  0x47   : > { %953 = vrot.lane.b32.xlu1 %v918_v34, %s2796_s7 }
  0x48   : > { %v815_v63 = vrot.slane %v550_v56, 2  ;;  %v1042_v15 = vrot.slane %v550_v56, 3  ;;  %v552_v28 = vrot.slane %v550_v56, 1  ;;  %v3143_v56 = vshrl.u32 %v3130_v51, 16 }
  0x4a   : > { %989 = vrot.lane.b32.xlu0 %v918_v34, %s2799_s14  ;;  %v816_v5 = vor.u32 %v815_v63, %v814_v62  ;;  %v1043_v21 = vor.u32 %v1042_v15, %v1041_v14  ;;  %v553_v32 = vsel %vm493_vm2, %v548_v27, %v552_v28  ;;  %v556_v33 = vor.u32 %v554_v57, %v552_v28 }
  0x4b   : > { %991 = vrot.lane.b32.xlu1 %v920_v40, %s2799_s14  ;;  %v560_v34 = vrot.slane %v3075_v12, 1  ;;  %v1053_v61 = vrot.slane %v3143_v56, 2  ;;  %v1054_v62 = vrot.slane %v3140_v55, 3 }
  0x4c   : > { %v817_v10 = vsel %vm790_vm3, %v812_v3, %v816_v5  ;;  %v1044_v24 = vsel %vm1021_vm4, %v1039_v41, %v1043_v21  ;;  %v818_v41 = vrot.slane %v3078_v13, 1 }
  0x4d   : > { %v561_v37 = vsel %vm493_vm2, %v556_v33, %v560_v34  ;;  %v564_v15 = vor.u32 %v3078_v13, %v560_v34  ;;  %v700_v34 = vrot.slane %v3184_v17, 1 }
  0x4e   : > { %1106 = vrot.lane.b32.xlu0 %v1036_v42, %s2800_s15  ;;  %v819_v42 = vrot.slane %v3075_v12, 2 }
  0x4f   : > { %1108 = vrot.lane.b32.xlu1 %v1040_v45, %s2800_s15  ;;  %v696_v45 = vrot.slane %v3105_v36, 1 }
  0x51   : > { %v3125_v49 = vsel %vm678_vm0, %v694_v38, %v696_v45 }
  0x52   : > { %1180 = vrot.lane.b32.xlu0 %v1145_v48, %s2801_s16  ;;  %v820_v48 = vor.u32 %v819_v42, %v818_v41 }
  0x53   : > { %650 = vrot.lane.b32.xlu1 %v537_v50, %s2797_s8 }
  0x54   : > { %v821_v52 = vsel %vm790_vm3, %v816_v5, %v820_v48  ;;  %v3164_v5 = vor.u32 %v1054_v62, %v1053_v61 }
  0x56   : > { %1182 = vrot.lane.b32.xlu0 %v1147_v43, %s2801_s16 }
  0x57   : > { %652 = vrot.lane.b32.xlu1 %v545_v54, %s2797_s8  ;;  %v925_v54 = vrot.slane %v3105_v36, 2 }
  0x59   : > { %v926_v59 = vsel %vm909_vm1, %v923_v18, %v925_v54 }
  0x5a   : > { %724 = vrot.lane.b32.xlu0 %v689_v23, %s2795_s30  ;;  %v3089_v23 = vor.u32 %v1046_v20, %v1045_v19  ;;  %v1153_v19 = vsel %vm1138_vm5, %v1150_v31, %v1152_v11  ;;  %v1154_v20 = vrot.slane %v3130_v51, 3  ;;  %v3196_v31 = vshll.u32 %v3184_v17, 16 }
  0x5b   : > { %726 = vrot.lane.b32.xlu1 %v691_v60, %s2795_s30 }
  0x5c   : > { %v1048_v26 = vsel %vm1021_vm4, %v1043_v21, %v3089_v23  ;;  %v1155_v13 = vsel %vm1138_vm5, %v1152_v11, %v1154_v20  ;;  %v831_v42 = vrot.slane %v3196_v31, 2 }
  0x5e   : > { %762 = vrot.lane.b32.xlu0 %v691_v60, %s2794_s29  ;;  %v927_v60 = vrot.slane %v3130_v51, 2 }
  0x5f   : > { %764 = vrot.lane.b32.xlu1 %v693_v4, %s2794_s29 }
  0x62   : > { %881 = vrot.lane.b32.xlu0 %v813_v7, %s2798_s13 }
  0x63   : > { %883 = vrot.lane.b32.xlu1 %v817_v10, %s2798_s13 }
  0x66   : > { %955 = vrot.lane.b32.xlu0 %v920_v40, %s2796_s7  ;;  %v570_v40 = vshrl.u32 %v3105_v36, 16 }
  0x67   : > { %957 = vrot.lane.b32.xlu1 %v922_v16, %s2796_s7 }
  0x68   : > { %v822_v46 = vrot.slane %v570_v40, 1  ;;  %v1049_v57 = vrot.slane %v570_v40, 2 }
  0x6a   : > { %993 = vrot.lane.b32.xlu0 %v922_v16, %s2799_s14  ;;  %v3127_v50 = vor.u32 %v823_v47, %v822_v46  ;;  %v1051_v63 = vor.u32 %v1050_v58, %v1049_v57  ;;  %v568_v16 = vrot.slane %v566_v39, 1  ;;  %v929_v57 = vrot.slane %v3184_v17, 2 }
  0x6b   : > { %995 = vrot.lane.b32.xlu1 %v924_v22, %s2799_s14 }
  0x6c   : > { %v825_v43 = vsel %vm790_vm3, %v820_v48, %v3127_v50  ;;  %v1052_v10 = vsel %vm1021_vm4, %v3089_v23, %v1051_v63  ;;  %v1056_v14 = vsel %vm1021_vm4, %v1051_v63, %v3164_v5  ;;  %v572_v23 = vor.u32 %v570_v40, %v568_v16 }
  0x6e   : > { %1110 = vrot.lane.b32.xlu0 %v1044_v24, %s2800_s15  ;;  %v576_v24 = vrot.slane %v3140_v55, 1 }
  0x6f   : > { %1112 = vrot.lane.b32.xlu1 %v1048_v26, %s2800_s15 }
  0x70   : > { %v577_v28 = vsel %vm493_vm2, %v572_v23, %v576_v24 }
  0x72   : > { %1184 = vrot.lane.b32.xlu0 %v1149_v29, %s2801_s16  ;;  %v698_v29 = vrot.slane %v3130_v51, 1 }
  0x73   : > { %654 = vrot.lane.b32.xlu1 %v553_v32, %s2797_s8  ;;  %v3199_v32 = vshrl.u32 %v3184_v17, 16 }
  0x74   : > { %v699_v40 = vsel %vm678_vm0, %v696_v45, %v698_v29  ;;  %v3222_v45 = vsel %vm678_vm0, %v698_v29, %v700_v34 }
  0x75   : > { %v830_v41 = vrot.slane %v3199_v32, 1 }
  0x76   : > { %1186 = vrot.lane.b32.xlu0 %v1151_v30, %s2801_s16  ;;  %v826_v30 = vrot.slane %v3143_v56, 1 }
  0x77   : > { %656 = vrot.lane.b32.xlu1 %v561_v37, %s2797_s8  ;;  %v827_v37 = vrot.slane %v3140_v55, 2 }
  0x7a   : > { %728 = vrot.lane.b32.xlu0 %v693_v4, %s2795_s30  ;;  %v3162_v4 = vsel %vm909_vm1, %v925_v54, %v927_v60 }
  0x7b   : > { %730 = vrot.lane.b32.xlu1 %v695_v44, %s2795_s30 }
  0x7e   : > { %766 = vrot.lane.b32.xlu0 %v695_v44, %s2794_s29 }
  0x7f   : > { %768 = vrot.lane.b32.xlu1 %v3125_v49, %s2794_s29 }
  0x82   : > { %885 = vrot.lane.b32.xlu0 %v821_v52, %s2798_s13  ;;  %v3224_v52 = vor.u32 %v831_v42, %v830_v41 }
  0x83   : > { %887 = vrot.lane.b32.xlu1 %v825_v43, %s2798_s13  ;;  %v3227_v43 = vld [vmem:[%s2861_s28 + $0x60] sm:$0xff]  }
  0x86   : > { %959 = vrot.lane.b32.xlu0 %v924_v22, %s2796_s7  ;;  %v569_v22 = vsel %vm493_vm2, %v564_v15, %v568_v16  ;;  %v1057_v16 = vrot.slane %v3199_v32, 2 }
  0x87   : > { %961 = vrot.lane.b32.xlu1 %v926_v59, %s2796_s7 }
  0x88   : > { %v755_v3 = vpop.permute.xlu0 %754 }
  0x89   : > { %v717_v7 = vpop.permute.xlu1 %716 }
  0x8a   : > { %997 = vrot.lane.b32.xlu0 %v926_v59, %s2799_s14 }
  0x8b   : > { %999 = vrot.lane.b32.xlu1 %v3162_v4, %s2799_s14 }
  0x8c   : > { %v3172_v12 = vpop.permute.xlu0 %947 }
  0x8d   : > { %v719_v18 = vpop.permute.xlu1 %718 }
  0x8e   : > { %1114 = vrot.lane.b32.xlu0 %v1052_v10, %s2800_s15 }
  0x8f   : > { %1116 = vrot.lane.b32.xlu1 %v1056_v14, %s2800_s15 }
  0x90   : > { %v643_v21 = vpop.permute.xlu0 %642 }
  0x91   : > { %v757_v26 = vpop.permute.xlu1 %756  ;;  %v1214_v38 = vsel %vm1212_vm7, %v2870_v2, %v643_v21  ;;  %v828_v2 = vor.u32 %v827_v37, %v826_v30  ;;  %v931_v21 = vrot.slane %v3227_v43, 2 }
  0x92   : > { %1188 = vrot.lane.b32.xlu0 %v1153_v19, %s2801_s16  ;;  %v1251_v47 = vsel %vm1249_vm8, %v1214_v38, %v717_v7  ;;  %v3245_v7 = vshrl.u32 %v3227_v43, 16 }
  0x93   : > { %658 = vrot.lane.b32.xlu1 %v569_v22, %s2797_s8  ;;  %v1288_v54 = vsel %vm1286_vm9, %v1251_v47, %v755_v3  ;;  %v829_v59 = vsel %vm790_vm3, %v3127_v50, %v828_v2  ;;  %v833_v63 = vsel %vm790_vm3, %v828_v2, %v3224_v52  ;;  %v3242_v3 = vshll.u32 %v3227_v43, 16 }
  0x94   : > { %v645_v27 = vpop.permute.xlu0 %644  ;;  %v930_v50 = vsel %vm909_vm1, %v927_v60, %v929_v57  ;;  %v1061_v22 = vrot.slane %v3245_v7, 2  ;;  %v3273_v37 = vsel %vm909_vm1, %v929_v57, %v931_v21  ;;  %v1158_v2 = vrot.slane %v3227_v43, 3 }
  0x95   : > { %v950_v33 = vpop.permute.xlu1 %949  ;;  %v1216_v46 = vsel %vm1212_vm7, %v2864_v0, %v645_v27  ;;  %v1062_v60 = vrot.slane %v3242_v3, 3 }
  0x96   : > { %1190 = vrot.lane.b32.xlu0 %v1155_v13, %s2801_s16  ;;  %v1253_v0 = vsel %vm1249_vm8, %v1216_v46, %v719_v18  ;;  %v1058_v18 = vrot.slane %v3196_v31, 3  ;;  %v584_v46 = vrot.slane %v3196_v31, 1 }
  0x97   : > { %660 = vrot.lane.b32.xlu1 %v577_v28, %s2797_s8  ;;  %v1290_v61 = vsel %vm1286_vm9, %v1253_v0, %v757_v26  ;;  %v3275_v38 = vor.u32 %v1062_v60, %v1061_v22 }
  0x98   : > { %v874_v39 = vpop.permute.xlu0 %873  ;;  %v1059_v28 = vor.u32 %v1058_v18, %v1057_v16  ;;  %v588_v55 = vor.u32 %v3199_v32, %v584_v46  ;;  %v702_v32 = vrot.slane %v3227_v43, 1 }
  0x99   : > { %v876_v44 = vpop.permute.xlu1 %875  ;;  %v1325_v58 = vsel %vm1323_vm10, %v1288_v54, %v874_v39 }
  0x9a   : > { %732 = vrot.lane.b32.xlu0 %v3125_v49, %s2795_s30  ;;  %v1362_v11 = vsel %vm1360_vm11, %v1325_v58, %v3172_v12  ;;  %v1327_v14 = vsel %vm1323_vm10, %v1290_v61, %v876_v44  ;;  %v1060_v39 = vsel %vm1021_vm4, %v3164_v5, %v1059_v28  ;;  %v1064_v42 = vsel %vm1021_vm4, %v1059_v28, %v3275_v38 }
  0x9b   : > { %734 = vrot.lane.b32.xlu1 %v699_v40, %s2795_s30  ;;  %v1364_v13 = vsel %vm1360_vm11, %v1327_v14, %v950_v33  ;;  %v580_v44 = vor.u32 %v3143_v56, %v576_v24  ;;  %v592_v56 = vrot.slane %v3242_v3, 1  ;;  %v3303_v24 = vld [vmem:[%s2861_s28 + $0x68] sm:$0xff]   ;;  %v835_v61 = vrot.slane %v3242_v3, 2 }
  0x9c   : > { %v986_v48 = vpop.permute.xlu0 %985  ;;  %v3315_v54 = vshll.u32 %v3303_v24, 16  ;;  %v3318_v57 = vshrl.u32 %v3303_v24, 16 }
  0x9d   : > { %v988_v49 = vpop.permute.xlu1 %987  ;;  %v1399_v15 = vsel %vm1397_vm12, %v1362_v11, %v986_v48  ;;  %v585_v0 = vsel %vm493_vm2, %v580_v44, %v584_v46 }
  0x9e   : > { %770 = vrot.lane.b32.xlu0 %v699_v40, %s2794_s29  ;;  %v1401_v27 = vsel %vm1397_vm12, %v1364_v13, %v988_v49  ;;  %v1156_v40 = vrot.slane %v3184_v17, 3  ;;  %v593_v49 = vsel %vm493_vm2, %v588_v55, %v592_v56  ;;  %v838_v11 = vrot.slane %v3318_v57, 1 }
  0x9f   : > { %772 = vrot.lane.b32.xlu1 %v3222_v45, %s2794_s29  ;;  %v1065_v44 = vrot.slane %v3318_v57, 2 }
  0xa0   : > { %v1103_v62 = vpop.permute.xlu0 %1102  ;;  %v1157_v5 = vsel %vm1138_vm5, %v1154_v20, %v1156_v40  ;;  %v1159_v51 = vsel %vm1138_vm5, %v1156_v40, %v1158_v2 }
  0xa1   : > { %v1105_v10 = vpop.permute.xlu1 %1104  ;;  %v1436_v12 = vsel %vm1434_vm13, %v1399_v15, %v1103_v62 }
  0xa2   : > { %889 = vrot.lane.b32.xlu0 %v829_v59, %s2798_s13  ;;  %v1438_v29 = vsel %vm1434_vm13, %v1401_v27, %v1105_v10  ;;  %v834_v59 = vrot.slane %v3245_v7, 1  ;;  %v704_v10 = vrot.slane %v3303_v24, 1 }
  0xa3   : > { %891 = vrot.lane.b32.xlu1 %v833_v63, %s2798_s13  ;;  %v703_v63 = vsel %vm678_vm0, %v700_v34, %v702_v32 }
  0xa4   : > { %v1177_v19 = vpop.permute.xlu0 %1176  ;;  %v836_v15 = vor.u32 %v835_v61, %v834_v59  ;;  %v3336_v18 = vsel %vm678_vm0, %v702_v32, %v704_v10 }
  0xa5   : > { %v647_v23 = vpop.permute.xlu1 %646  ;;  %v1473_v26 = vsel %vm1471_vm14, %v1436_v12, %v1177_v19  ;;  %v3341_v12 = vld [vmem:[%s2861_s28 + $0x70] sm:$0xff]  }
  0xa6   : > { %963 = vrot.lane.b32.xlu0 %v3162_v4, %s2796_s7  ;;  %2634 = vmatprep.mubr.msk.bf16.mxu0 %vm1535_vm15, %v1473_v26  ;;  %v1218_v22 = vsel %vm1212_vm7, %v2867_v1, %v647_v23  ;;  %v837_v26 = vsel %vm790_vm3, %v3224_v52, %v836_v15  ;;  %v3356_v1 = vshll.u32 %v3341_v12, 16  ;;  %v3359_v23 = vshrl.u32 %v3341_v12, 16 }
  0xa7   : > { %965 = vrot.lane.b32.xlu1 %v930_v50, %s2796_s7  ;;  %v935_v40 = vrot.slane %v3341_v12, 2 }
  0xa8   : > { %v1179_v30 = vpop.permute.xlu0 %1178 }
  0xa9   : > { %v3277_v33 = vpop.permute.xlu1 %648  ;;  %v1475_v4 = vsel %vm1471_vm14, %v1438_v29, %v1179_v30 }
  0xaa   : > { %1001 = vrot.lane.b32.xlu0 %v930_v50, %s2799_s14  ;;  %2635 = vmatmul.mubr.msk.bf16.vlgmr.msra.gmra.mrb[0].mxu0 %vm1535_vm15, %v1475_v4  ;;  %v839_v50 = vrot.slane %v3315_v54, 2  ;;  %v1220_v4 = vsel %vm1212_vm7, %v2878_v8, %v3277_v33  ;;  %v1066_v8 = vrot.slane %v3315_v54, 3 }
  0xab   : > { %1003 = vrot.lane.b32.xlu1 %v3273_v37, %s2799_s14 }
  0xac   : > { %v721_v41 = vpop.permute.xlu0 %720  ;;  %v3338_v34 = vor.u32 %v839_v50, %v838_v11 }
  0xad   : > { %v723_v47 = vpop.permute.xlu1 %722  ;;  %v1255_v60 = vsel %vm1249_vm8, %v1218_v22, %v721_v41 }
  0xae   : > { %1118 = vrot.lane.b32.xlu0 %v1060_v39, %s2800_s15  ;;  %v841_v28 = vsel %vm790_vm3, %v836_v15, %v3338_v34  ;;  %v1257_v41 = vsel %vm1249_vm8, %v1220_v4, %v723_v47  ;;  %v600_v15 = vrot.slane %v3315_v54, 1 }
  0xaf   : > { %1120 = vrot.lane.b32.xlu1 %v1064_v42, %s2800_s15 }
  0xb0   : > { %v759_v48 = vpop.permute.xlu0 %758  ;;  %v604_v3 = vor.u32 %v3318_v57, %v600_v15  ;;  %v706_v57 = vrot.slane %v3341_v12, 1 }
  0xb1   : > { %v761_v31 = vpop.permute.xlu1 %760  ;;  %v1292_v13 = vsel %vm1286_vm9, %v1255_v60, %v759_v48  ;;  %v1069_v48 = vrot.slane %v3359_v23, 2 }
  0xb2   : > { %1192 = vrot.lane.b32.xlu0 %v1157_v5, %s2801_s16  ;;  %v1294_v33 = vsel %vm1286_vm9, %v1257_v41, %v761_v31 }
  0xb3   : > { %662 = vrot.lane.b32.xlu1 %v585_v0, %s2797_s8 }
  0xb4   : > { %v878_v20 = vpop.permute.xlu0 %877 }
  0xb5   : > { %v880_v58 = vpop.permute.xlu1 %879  ;;  %v1329_v29 = vsel %vm1323_vm10, %v1292_v13, %v878_v20  ;;  %v1067_v20 = vor.u32 %v1066_v8, %v1065_v44 }
  0xb6   : > { %1194 = vrot.lane.b32.xlu0 %v1159_v51, %s2801_s16  ;;  %v1331_v0 = vsel %vm1323_vm10, %v1294_v33, %v880_v58 }
  0xb7   : > { %664 = vrot.lane.b32.xlu1 %v593_v49, %s2797_s8 }
  0xb8   : > { %v952_v62 = vpop.permute.xlu0 %951 }
  0xb9   : > { %v954_v14 = vpop.permute.xlu1 %953  ;;  %v1366_v52 = vsel %vm1360_vm11, %v1329_v29, %v952_v62  ;;  %v1068_v62 = vsel %vm1021_vm4, %v3275_v38, %v1067_v20  ;;  %v842_v29 = vrot.slane %v3359_v23, 1 }
  0xba   : > { %736 = vrot.lane.b32.xlu0 %v3222_v45, %s2795_s30  ;;  %v933_v45 = vrot.slane %v3303_v24, 2  ;;  %v1368_v51 = vsel %vm1360_vm11, %v1331_v0, %v954_v14  ;;  %v596_v14 = vor.u32 %v3245_v7, %v592_v56  ;;  %v608_v7 = vrot.slane %v3356_v1, 1  ;;  %v3422_v56 = vld [vmem:[%s2861_s28 + $0x78] sm:$0xff]  }
  0xbb   : > { %738 = vrot.lane.b32.xlu1 %v703_v63, %s2795_s30  ;;  %v3434_v13 = vshll.u32 %v3422_v56, 16 }
  0xbc   : > { %v990_v16 = vpop.permute.xlu0 %989  ;;  %v934_v39 = vsel %vm909_vm1, %v931_v21, %v933_v45  ;;  %v1070_v21 = vrot.slane %v3356_v1, 3  ;;  %v3392_v58 = vsel %vm909_vm1, %v933_v45, %v935_v40  ;;  %v601_v45 = vsel %vm493_vm2, %v596_v14, %v600_v15 }
  0xbd   : > { %v992_v19 = vpop.permute.xlu1 %991  ;;  %v1403_v42 = vsel %vm1397_vm12, %v1366_v52, %v990_v16  ;;  %v707_v52 = vsel %vm678_vm0, %v704_v10, %v706_v57 }
  0xbe   : > { %774 = vrot.lane.b32.xlu0 %v703_v63, %s2794_s29  ;;  %v1405_v31 = vsel %vm1397_vm12, %v1368_v51, %v992_v19  ;;  %v3394_v59 = vor.u32 %v1070_v21, %v1069_v48  ;;  %v1160_v63 = vrot.slane %v3303_v24, 3  ;;  %v1162_v19 = vrot.slane %v3341_v12, 3 }
  0xbf   : > { %776 = vrot.lane.b32.xlu1 %v3336_v18, %s2794_s29 }
  0xc0   : > { %v1107_v27 = vpop.permute.xlu0 %1106  ;;  %v1072_v50 = vsel %vm1021_vm4, %v1067_v20, %v3394_v59  ;;  %v1161_v38 = vsel %vm1138_vm5, %v1158_v2, %v1160_v63  ;;  %v1163_v2 = vsel %vm1138_vm5, %v1160_v63, %v1162_v19 }
  0xc1   : > { %v1109_v30 = vpop.permute.xlu1 %1108  ;;  %v1440_v46 = vsel %vm1434_vm13, %v1403_v42, %v1107_v27  ;;  %v3437_v27 = vshrl.u32 %v3422_v56, 16  ;;  %v847_v42 = vrot.slane %v3434_v13, 2 }
  0xc2   : > { %893 = vrot.lane.b32.xlu0 %v837_v26, %s2798_s13  ;;  %v1442_v49 = vsel %vm1434_vm13, %v1405_v31, %v1109_v30  ;;  %v609_v26 = vsel %vm493_vm2, %v604_v3, %v608_v7  ;;  %v843_v30 = vrot.slane %v3356_v1, 2 }
  0xc3   : > { %895 = vrot.lane.b32.xlu1 %v841_v28, %s2798_s13  ;;  %v846_v41 = vrot.slane %v3437_v27, 1  ;;  %v1073_v14 = vrot.slane %v3437_v27, 2 }
  0xc4   : > { %v1181_v5 = vpop.permute.xlu0 %1180  ;;  %v844_v8 = vor.u32 %v843_v30, %v842_v29 }
  0xc5   : > { %v651_v47 = vpop.permute.xlu1 %650  ;;  %v1477_v55 = vsel %vm1471_vm14, %v1440_v46, %v1181_v5  ;;  %v3457_v10 = vor.u32 %v847_v42, %v846_v41  ;;  %v3460_v5 = vld [vmem:[%s2861_s28 + $0x80] sm:$0xff]  }
  0xc6   : > { %967 = vrot.lane.b32.xlu0 %v3273_v37, %s2796_s7  ;;  %2638 = vmatprep.mubr.msk.bf16.mxu0 %vm1535_vm15, %v1477_v55  ;;  %v1222_v21 = vsel %vm1212_vm7, %v2917_v35, %v651_v47  ;;  %v845_v55 = vsel %vm790_vm3, %v3338_v34, %v844_v8  ;;  %v3475_v35 = vshll.u32 %v3460_v5, 16  ;;  %v3478_v47 = vshrl.u32 %v3460_v5, 16 }
  0xc7   : > { %969 = vrot.lane.b32.xlu1 %v934_v39, %s2796_s7  ;;  %v849_v20 = vsel %vm790_vm3, %v844_v8, %v3457_v10  ;;  %v939_v63 = vrot.slane %v3460_v5, 2  ;;  %v616_v8 = vrot.slane %v3434_v13, 1 }
  0xc8   : > { %v1183_v32 = vpop.permute.xlu0 %1182 }
  0xc9   : > { %v3396_v61 = vpop.permute.xlu1 %652  ;;  %v1479_v37 = vsel %vm1471_vm14, %v1442_v49, %v1183_v32  ;;  %v620_v1 = vor.u32 %v3437_v27, %v616_v8  ;;  %v710_v27 = vrot.slane %v3460_v5, 1 }
  0xca   : > { %1005 = vrot.lane.b32.xlu0 %v934_v39, %s2799_s14  ;;  %2639 = vmatmul.mubr.msk.bf16.gmra.mrb[4].mxu0 %vm1535_vm15, %v1479_v37  ;;  %v708_v39 = vrot.slane %v3422_v56, 1  ;;  %v1224_v37 = vsel %vm1212_vm7, %v2977_v9, %v3396_v61  ;;  %v1074_v9 = vrot.slane %v3434_v13, 3 }
  0xcb   : > { %1007 = vrot.lane.b32.xlu1 %v3392_v58, %s2799_s14 }
  0xcc   : > { %v725_v11 = vpop.permute.xlu0 %724  ;;  %v3455_v46 = vsel %vm678_vm0, %v706_v57, %v708_v39 }
  0xcd   : > { %v727_v16 = vpop.permute.xlu1 %726  ;;  %v1259_v0 = vsel %vm1249_vm8, %v1222_v21, %v725_v11 }
  0xce   : > { %1122 = vrot.lane.b32.xlu0 %v1068_v62, %s2800_s15  ;;  %v1261_v11 = vsel %vm1249_vm8, %v1224_v37, %v727_v16 }
  0xcf   : > { %1124 = vrot.lane.b32.xlu1 %v1072_v50, %s2800_s15 }
  0xd0   : > { %v763_v22 = vpop.permute.xlu0 %762 }
  0xd1   : > { %v765_v54 = vpop.permute.xlu1 %764  ;;  %v1296_v51 = vsel %vm1286_vm9, %v1259_v0, %v763_v22  ;;  %v1077_v22 = vrot.slane %v3478_v47, 2 }
  0xd2   : > { %1196 = vrot.lane.b32.xlu0 %v1161_v38, %s2801_s16  ;;  %v1298_v61 = vsel %vm1286_vm9, %v1261_v11, %v765_v54 }
  0xd3   : > { %666 = vrot.lane.b32.xlu1 %v601_v45, %s2797_s8 }
  0xd4   : > { %v882_v60 = vpop.permute.xlu0 %881 }
  0xd5   : > { %v884_v28 = vpop.permute.xlu1 %883  ;;  %v1333_v49 = vsel %vm1323_vm10, %v1296_v51, %v882_v60  ;;  %v1075_v60 = vor.u32 %v1074_v9, %v1073_v14 }
  0xd6   : > { %1198 = vrot.lane.b32.xlu0 %v1163_v2, %s2801_s16  ;;  %v1335_v45 = vsel %vm1323_vm10, %v1298_v61, %v884_v28 }
  0xd7   : > { %668 = vrot.lane.b32.xlu1 %v609_v26, %s2797_s8 }
  0xd8   : > { %v956_v4 = vpop.permute.xlu0 %955 }
  0xd9   : > { %v958_v44 = vpop.permute.xlu1 %957  ;;  %v1370_v34 = vsel %vm1360_vm11, %v1333_v49, %v956_v4  ;;  %v1076_v4 = vsel %vm1021_vm4, %v3394_v59, %v1075_v60  ;;  %v850_v49 = vrot.slane %v3478_v47, 1 }
  0xda   : > { %740 = vrot.lane.b32.xlu0 %v3336_v18, %s2795_s30  ;;  %v937_v18 = vrot.slane %v3422_v56, 2  ;;  %v1372_v2 = vsel %vm1360_vm11, %v1335_v45, %v958_v44  ;;  %v612_v44 = vor.u32 %v3359_v23, %v608_v7  ;;  %v624_v23 = vrot.slane %v3475_v35, 1  ;;  %v3541_v7 = vld [vmem:[%s2861_s28 + $0x88] sm:$0xff]  }
  0xdb   : > { %742 = vrot.lane.b32.xlu1 %v707_v52, %s2795_s30  ;;  %v3553_v51 = vshll.u32 %v3541_v7, 16 }
  0xdc   : > { %v994_v33 = vpop.permute.xlu0 %993  ;;  %v938_v62 = vsel %vm909_vm1, %v935_v40, %v937_v18  ;;  %v1078_v40 = vrot.slane %v3475_v35, 3  ;;  %v3511_v28 = vsel %vm909_vm1, %v937_v18, %v939_v63  ;;  %v617_v18 = vsel %vm493_vm2, %v612_v44, %v616_v8 }
  0xdd   : > { %v996_v48 = vpop.permute.xlu1 %995  ;;  %v1407_v50 = vsel %vm1397_vm12, %v1370_v34, %v994_v33  ;;  %v711_v34 = vsel %vm678_vm0, %v708_v39, %v710_v27 }
  0xde   : > { %778 = vrot.lane.b32.xlu0 %v707_v52, %s2794_s29  ;;  %v1409_v54 = vsel %vm1397_vm12, %v1372_v2, %v996_v48  ;;  %v3513_v29 = vor.u32 %v1078_v40, %v1077_v22  ;;  %v1164_v52 = vrot.slane %v3422_v56, 3  ;;  %v1166_v48 = vrot.slane %v3460_v5, 3 }
  0xdf   : > { %780 = vrot.lane.b32.xlu1 %v3455_v46, %s2794_s29 }
  0xe0   : > { %v1111_v31 = vpop.permute.xlu0 %1110  ;;  %v1080_v42 = vsel %vm1021_vm4, %v1075_v60, %v3513_v29  ;;  %v1165_v59 = vsel %vm1138_vm5, %v1162_v19, %v1164_v52  ;;  %v1167_v19 = vsel %vm1138_vm5, %v1164_v52, %v1166_v48 }
  0xe1   : > { %v1113_v32 = vpop.permute.xlu1 %1112  ;;  %v1444_v15 = vsel %vm1434_vm13, %v1407_v50, %v1111_v31  ;;  %v3556_v31 = vshrl.u32 %v3541_v7, 16  ;;  %v855_v50 = vrot.slane %v3553_v51, 2 }
  0xe2   : > { %897 = vrot.lane.b32.xlu0 %v845_v55, %s2798_s13  ;;  %v1446_v26 = vsel %vm1434_vm13, %v1409_v54, %v1113_v32  ;;  %v625_v55 = vsel %vm493_vm2, %v620_v1, %v624_v23  ;;  %v851_v32 = vrot.slane %v3475_v35, 2 }
  0xe3   : > { %899 = vrot.lane.b32.xlu1 %v849_v20, %s2798_s13  ;;  %v854_v11 = vrot.slane %v3556_v31, 1  ;;  %v1081_v44 = vrot.slane %v3556_v31, 2 }
  0xe4   : > { %v1185_v38 = vpop.permute.xlu0 %1184  ;;  %v852_v9 = vor.u32 %v851_v32, %v850_v49 }
  0xe5   : > { %v655_v16 = vpop.permute.xlu1 %654  ;;  %v1481_v3 = vsel %vm1471_vm14, %v1444_v15, %v1185_v38  ;;  %v3576_v39 = vor.u32 %v855_v50, %v854_v11  ;;  %v3579_v38 = vld [vmem:[%s3155_s26] sm:$0xff]   ;;  %v1168_v50 = vrot.slane %v3541_v7, 3 }
  0xe6   : > { %971 = vrot.lane.b32.xlu0 %v3392_v58, %s2796_s7  ;;  %2642 = vmatprep.mubr.msk.bf16.mxu0 %vm1535_vm15, %v1481_v3  ;;  %v1226_v40 = vsel %vm1212_vm7, %v3001_v25, %v655_v16  ;;  %v853_v3 = vsel %vm790_vm3, %v3457_v10, %v852_v9  ;;  %v3594_v25 = vshll.u32 %v3579_v38, 16  ;;  %v858_v16 = vshrl.u32 %v3579_v38, 16 }
  0xe7   : > { %973 = vrot.lane.b32.xlu1 %v938_v62, %s2796_s7  ;;  %v857_v60 = vsel %vm790_vm3, %v852_v9, %v3576_v39  ;;  %v943_v52 = vrot.slane %v3579_v38, 2 }
  0xe8   : > { %v1187_v57 = vpop.permute.xlu0 %1186 }
  0xe9   : > { %v3515_v30 = vpop.permute.xlu1 %656  ;;  %v1483_v58 = vsel %vm1471_vm14, %v1446_v26, %v1187_v57 }
  0xea   : > { %1009 = vrot.lane.b32.xlu0 %v938_v62, %s2799_s14  ;;  %2643 = vmatmul.mubr.msk.bf16.gmra.mrb[8].mxu0 %vm1535_vm15, %v1483_v58  ;;  %v712_v62 = vrot.slane %v3541_v7, 1  ;;  %v1228_v58 = vsel %vm1212_vm7, %v3047_v53, %v3515_v30  ;;  %v1082_v53 = vrot.slane %v3553_v51, 3 }
  0xeb   : > { %1011 = vrot.lane.b32.xlu1 %v3511_v28, %s2799_s14 }
  0xec   : > { %v729_v41 = vpop.permute.xlu0 %728  ;;  %v3574_v15 = vsel %vm678_vm0, %v710_v27, %v712_v62  ;;  %v1083_v27 = vor.u32 %v1082_v53, %v1081_v44 }
  0xed   : > { %v731_v33 = vpop.permute.xlu1 %730  ;;  %v1263_v45 = vsel %vm1249_vm8, %v1226_v40, %v729_v41 }
  0xee   : > { %1126 = vrot.lane.b32.xlu0 %v1076_v4, %s2800_s15  ;;  %v1265_v41 = vsel %vm1249_vm8, %v1228_v58, %v731_v33  ;;  %v1807_v33 = vld [vmem:[%s3959_s4] sm:$0x3]  ;;  %v1084_v11 = vsel %vm1021_vm4, %v3513_v29, %v1083_v27  ;;  %v1169_v29 = vsel %vm1138_vm5, %v1166_v48, %v1168_v50  ;;  %v860_v58 = vrot.slane %v858_v16, 1 }
  0xef   : > { %1128 = vrot.lane.b32.xlu1 %v1080_v42, %s2800_s15  ;;  %2709 = vmatprep.subr.msk.bf16.mxu1 %vm1572_vm6, %v1807_v33 }
  0xf0   : > { %v767_v21 = vpop.permute.xlu0 %766 }
  0xf1   : > { %v769_v13 = vpop.permute.xlu1 %768  ;;  %v1300_v2 = vsel %vm1286_vm9, %v1263_v45, %v767_v21  ;;  %v1086_v21 = vrot.slane %v3594_v25, 3 }
  0xf2   : > { %1200 = vrot.lane.b32.xlu0 %v1165_v59, %s2801_s16  ;;  %v1302_v30 = vsel %vm1286_vm9, %v1265_v41, %v769_v13  ;;  %v1870_v13 = vsel %vm1572_vm6, %v1807_v33, 0 }
  0xf3   : > { %670 = vrot.lane.b32.xlu1 %v617_v18, %s2797_s8  ;;  %2671 = vmatpush3.bf16.msra.mxu1 %v1870_v13 }
  0xf4   : > { %v886_v0 = vpop.permute.xlu0 %885 }
  0xf5   : > { %v888_v20 = vpop.permute.xlu1 %887  ;;  %v1337_v26 = vsel %vm1323_vm10, %v1300_v2, %v886_v0 }
  0xf6   : > { %1202 = vrot.lane.b32.xlu0 %v1167_v19, %s2801_s16  ;;  %v1339_v18 = vsel %vm1323_vm10, %v1302_v30, %v888_v20 }
  0xf7   : > { %672 = vrot.lane.b32.xlu1 %v625_v55, %s2797_s8 }
  0xf8   : > { %v960_v37 = vpop.permute.xlu0 %959 }
  0xf9   : > { %v962_v14 = vpop.permute.xlu1 %961  ;;  %v1374_v10 = vsel %vm1360_vm11, %v1337_v26, %v960_v37 }
  0xfa   : > { %744 = vrot.lane.b32.xlu0 %v3455_v46, %s2795_s30  ;;  %v941_v46 = vrot.slane %v3541_v7, 2  ;;  %v1376_v0 = vsel %vm1360_vm11, %v1339_v18, %v962_v14 }
  0xfb   : > { %746 = vrot.lane.b32.xlu1 %v711_v34, %s2795_s30 }
  0xfc   : > { %v998_v61 = vpop.permute.xlu0 %997  ;;  %v942_v4 = vsel %vm909_vm1, %v939_v63, %v941_v46  ;;  %v1085_v63 = vrot.slane %v858_v16, 2  ;;  %v3636_v32 = vsel %vm909_vm1, %v941_v46, %v943_v52  ;;  %v1170_v46 = vrot.slane %v3579_v38, 3 }
  0xfd   : > { %v1000_v22 = vpop.permute.xlu1 %999  ;;  %v1411_v42 = vsel %vm1397_vm12, %v1374_v10, %v998_v61  ;;  %v628_v61 = vor.u32 %v3478_v47, %v624_v23  ;;  %v640_v47 = vrot.slane %v3594_v25, 1  ;;  %v3666_v23 = vld [vmem:[%s3155_s26 + $0x8] sm:$0xff]   ;;  %v861_v10 = vrot.slane %v3594_v25, 2 }
  0xfe   : > { %782 = vrot.lane.b32.xlu0 %v711_v34, %s2794_s29  ;;  %v1413_v55 = vsel %vm1397_vm12, %v1376_v0, %v1000_v22  ;;  %v3638_v37 = vor.u32 %v1086_v21, %v1085_v63  ;;  %v632_v22 = vrot.slane %v3553_v51, 1  ;;  %v1171_v48 = vsel %vm1138_vm5, %v1168_v50, %v1170_v46  ;;  %v2768_v63 = vld [vmem:[%s3155_s26 + $0x10] sm:$0xff]  }
  0xff   : > { %784 = vrot.lane.b32.xlu1 %v3574_v15, %s2794_s29  ;;  %v868_v26 = vshll.u32 %v3666_v23, 16  ;;  %v945_v33 = vrot.slane %v3666_v23, 2 }
 0x100   : > { %v1115_v54 = vpop.permute.xlu0 %1114  ;;  %v1088_v9 = vsel %vm1021_vm4, %v1083_v27, %v3638_v37  ;;  %v636_v35 = vor.u32 %v3556_v31, %v632_v22  ;;  %v865_v31 = vshrl.u32 %v3666_v23, 16  ;;  %v1097_v27 = vshll.u32 %v2768_v63, 16 }
 0x101   : > { %v1117_v57 = vpop.permute.xlu1 %1116  ;;  %v1448_v8 = vsel %vm1434_vm13, %v1411_v42, %v1115_v54  ;;  %v752_v42 = vrot.slane %v3666_v23, 1  ;;  %v870_v53 = vrot.slane %v868_v26, 2 }
 0x102   : > { %901 = vrot.lane.b32.xlu0 %v853_v3, %s2798_s13  ;;  %v1450_v20 = vsel %vm1434_vm13, %v1413_v55, %v1117_v57  ;;  %v633_v3 = vsel %vm493_vm2, %v628_v61, %v632_v22  ;;  %v641_v54 = vsel %vm493_vm2, %v636_v35, %v640_v47  ;;  %v867_v44 = vrot.slane %v865_v31, 1 }
 0x103   : > { %903 = vrot.lane.b32.xlu1 %v857_v60, %s2798_s13  ;;  %v714_v60 = vrot.slane %v3579_v38, 1  ;;  %v1094_v55 = vshrl.u32 %v2768_v63, 16 }
 0x104   : > { %v1189_v59 = vpop.permute.xlu0 %1188  ;;  %v871_v25 = vor.u32 %v870_v53, %v867_v44 }
 0x105   : > { %v3621_v1 = vpop.permute.xlu1 %658  ;;  %v1485_v19 = vsel %vm1471_vm14, %v1448_v8, %v1189_v59  ;;  %v715_v41 = vsel %vm678_vm0, %v712_v62, %v714_v60  ;;  %v862_v8 = vor.u32 %v861_v10, %v860_v58  ;;  %v753_v16 = vsel %vm678_vm0, %v714_v60, %v752_v42 }
 0x106   : > { %975 = vrot.lane.b32.xlu0 %v3511_v28, %s2796_s7  ;;  %2646 = vmatprep.mubr.msk.bf16.mxu0 %vm1535_vm15, %v1485_v19  ;;  %v1230_v62 = vsel %vm1212_vm7, %v3066_v6, %v3621_v1  ;;  %v1096_v22 = vrot.slane %v1094_v55, 2  ;;  %v1174_v10 = vrot.slane %v2768_v63, 3 }
 0x107   : > { %977 = vrot.lane.b32.xlu1 %v942_v4, %s2796_s7  ;;  %v872_v0 = vsel %vm790_vm3, %v862_v8, %v871_v25  ;;  %v2769_v25 = vld [vmem:[%s2861_s28 + $0x50] sm:$0xff]  }
 0x108   : > { %v1191_v49 = vpop.permute.xlu0 %1190 }
 0x109   : > { %v3640_v34 = vpop.permute.xlu1 %660  ;;  %v1487_v28 = vsel %vm1471_vm14, %v1450_v20, %v1191_v49 }
 0x10a   : > { %1013 = vrot.lane.b32.xlu0 %v942_v4, %s2799_s14  ;;  %2647 = vmatmul.mubr.msk.bf16.gmra.mrb[12].mxu0 %vm1535_vm15, %v1487_v28  ;;  %v1232_v20 = vsel %vm1212_vm7, %v3105_v36, %v3640_v34  ;;  %v983_v28 = vrot.slane %v2768_v63, 2 }
 0x10b   : > { %1015 = vrot.lane.b32.xlu1 %v3636_v32, %s2799_s14 }
 0x10c   : > { %v733_v14 = vpop.permute.xlu0 %732 }
 0x10d   : > { %v735_v40 = vpop.permute.xlu1 %734  ;;  %v1267_v18 = vsel %vm1249_vm8, %v1230_v62, %v733_v14  ;;  %v1089_v14 = vrot.slane %v865_v31, 2 }
 0x10e   : > { %1130 = vrot.lane.b32.xlu0 %v1084_v11, %s2800_s15  ;;  %v1269_v11 = vsel %vm1249_vm8, %v1232_v20, %v735_v40 }
 0x10f   : > { %1132 = vrot.lane.b32.xlu1 %v1088_v9, %s2800_s15  ;;  %v1090_v9 = vrot.slane %v868_v26, 3  ;;  %v1172_v26 = vrot.slane %v3666_v23, 3 }
 0x110   : > { %v771_v45 = vpop.permute.xlu0 %770 }
 0x111   : > { %v773_v51 = vpop.permute.xlu1 %772  ;;  %v1304_v19 = vsel %vm1286_vm9, %v1267_v18, %v771_v45  ;;  %v1091_v47 = vor.u32 %v1090_v9, %v1089_v14  ;;  %v1175_v44 = vsel %vm1138_vm5, %v1172_v26, %v1174_v10 }
 0x112   : > { %1204 = vrot.lane.b32.xlu0 %v1169_v29, %s2801_s16  ;;  %v1306_v61 = vsel %vm1286_vm9, %v1269_v11, %v773_v51  ;;  %v1099_v29 = vrot.slane %v1097_v27, 3 }
 0x113   : > { %674 = vrot.lane.b32.xlu1 %v633_v3, %s2797_s8 }
 0x114   : > { %v890_v2 = vpop.permute.xlu0 %889 }
 0x115   : > { %v892_v57 = vpop.permute.xlu1 %891  ;;  %v1341_v6 = vsel %vm1323_vm10, %v1304_v19, %v890_v2  ;;  %v984_v2 = vsel %vm909_vm1, %v945_v33, %v983_v28 }
 0x116   : > { %1206 = vrot.lane.b32.xlu0 %v1171_v48, %s2801_s16  ;;  %v1343_v45 = vsel %vm1323_vm10, %v1306_v61, %v892_v57 }
 0x117   : > { %676 = vrot.lane.b32.xlu1 %v641_v54, %s2797_s8  ;;  %v1100_v54 = vor.u32 %v1099_v29, %v1096_v22  ;;  %s2712_s8 = smul.u32 144, %s3967_s21 }
 0x118   : > { %v964_v4 = vpop.permute.xlu0 %963 }
 0x119   : > { %v966_v30 = vpop.permute.xlu1 %965  ;;  %v1378_v49 = vsel %vm1360_vm11, %v1341_v6, %v964_v4  ;;  %v1101_v58 = vsel %vm1021_vm4, %v1091_v47, %v1100_v54  ;;  %s3882_s12 = scalar_lea.vmem %s3961_s6, %s2712_s8 }
 0x11a   : > { %748 = vrot.lane.b32.xlu0 %v3574_v15, %s2795_s30  ;;  %v863_v15 = vsel %vm790_vm3, %v3576_v39, %v862_v8  ;;  %v946_v39 = vsel %vm909_vm1, %v943_v52, %v945_v33  ;;  %v1380_v40 = vsel %vm1360_vm11, %v1343_v45, %v966_v30 }
 0x11b   : > { %750 = vrot.lane.b32.xlu1 %v715_v41, %s2795_s30 }
 0x11c   : > { %v1002_v59 = vpop.permute.xlu0 %1001 }
 0x11d   : > { %v1004_v21 = vpop.permute.xlu1 %1003  ;;  %v1415_v50 = vsel %vm1397_vm12, %v1378_v49, %v1002_v59 }
 0x11e   : > { %786 = vrot.lane.b32.xlu0 %v715_v41, %s2794_s29  ;;  %v1417_v35 = vsel %vm1397_vm12, %v1380_v40, %v1004_v21  ;;  %v1173_v41 = vsel %vm1138_vm5, %v1170_v46, %v1172_v26 }
 0x11f   : > { %788 = vrot.lane.b32.xlu1 %v753_v16, %s2794_s29 }
 0x120   : > { %v1119_v13 = vpop.permute.xlu0 %1118 }
 0x121   : > { %v1121_v1 = vpop.permute.xlu1 %1120  ;;  %v1452_v36 = vsel %vm1434_vm13, %v1415_v50, %v1119_v13 }
 0x122   : > { %905 = vrot.lane.b32.xlu0 %v863_v15, %s2798_s13  ;;  %v1454_v51 = vsel %vm1434_vm13, %v1417_v35, %v1121_v1 }
 0x123   : > { %907 = vrot.lane.b32.xlu1 %v872_v0, %s2798_s13 }
 0x124   : > { %v1193_v34 = vpop.permute.xlu0 %1192 }
 0x125   : > { %v663_v3 = vpop.permute.xlu1 %662  ;;  %v1489_v52 = vsel %vm1471_vm14, %v1452_v36, %v1193_v34 }
 0x126   : > { %979 = vrot.lane.b32.xlu0 %v3636_v32, %s2796_s7  ;;  %2650 = vmatprep.mubr.msk.bf16.mxu0 %vm1535_vm15, %v1489_v52  ;;  %v1092_v32 = vsel %vm1021_vm4, %v3638_v37, %v1091_v47  ;;  %v1234_v63 = vsel %vm1212_vm7, %v2769_v25, %v663_v3 }
 0x127   : > { %981 = vrot.lane.b32.xlu1 %v946_v39, %s2796_s7 }
 0x128   : > { %v1195_v48 = vpop.permute.xlu0 %1194 }
 0x129   : > { %v665_v60 = vpop.permute.xlu1 %664  ;;  %v1491_v31 = vsel %vm1471_vm14, %v1454_v51, %v1195_v48 }
 0x12a   : > { %1017 = vrot.lane.b32.xlu0 %v946_v39, %s2799_s14  ;;  %2651 = vmatmul.mubr.msk.bf16.gmra.mrb[16].mxu0 %vm1535_vm15, %v1491_v31  ;;  %v1236_v18 = vsel %vm1212_vm7, %v3184_v17, %v665_v60 }
 0x12b   : > { %1019 = vrot.lane.b32.xlu1 %v984_v2, %s2799_s14 }
 0x12c   : > { %v737_v57 = vpop.permute.xlu0 %736 }
 0x12d   : > { %v739_v4 = vpop.permute.xlu1 %738  ;;  %v1271_v38 = vsel %vm1249_vm8, %v1234_v63, %v737_v57 }
 0x12e   : > { %1134 = vrot.lane.b32.xlu0 %v1092_v32, %s2800_s15  ;;  %v1273_v19 = vsel %vm1249_vm8, %v1236_v18, %v739_v4 }
 0x12f   : > { %1136 = vrot.lane.b32.xlu1 %v1101_v58, %s2800_s15 }
 0x130   : > { %v775_v42 = vpop.permute.xlu0 %774 }
 0x131   : > { %v777_v37 = vpop.permute.xlu1 %776  ;;  %v1308_v46 = vsel %vm1286_vm9, %v1271_v38, %v775_v42 }
 0x132   : > { %1208 = vrot.lane.b32.xlu0 %v1173_v41, %s2801_s16  ;;  %v1310_v0 = vsel %vm1286_vm9, %v1273_v19, %v777_v37 }
 0x133   : > { %1210 = vrot.lane.b32.xlu1 %v1175_v44, %s2801_s16 }
 0x134   : > { %v894_v23 = vpop.permute.xlu0 %893 }
 0x135   : > { %v896_v53 = vpop.permute.xlu1 %895  ;;  %v1345_v62 = vsel %vm1323_vm10, %v1308_v46, %v894_v23  ;;  %v3785_v46 = vld [vmem:[%s3958_s3] ss:$0 sm:$0xff] }
 0x136   : > { %v1347_v6 = vsel %vm1323_vm10, %v1310_v0, %v896_v53 }
 0x138   : > { %v968_v30 = vpop.permute.xlu0 %967 }
 0x139   : > { %v970_v8 = vpop.permute.xlu1 %969  ;;  %v1382_v15 = vsel %vm1360_vm11, %v1345_v62, %v968_v30 }
 0x13a   : > { %v1384_v49 = vsel %vm1360_vm11, %v1347_v6, %v970_v8 }
 0x13c   : > { %v1006_v59 = vpop.permute.xlu0 %1005 }
 0x13d   : > { %v1008_v16 = vpop.permute.xlu1 %1007  ;;  %v1419_v13 = vsel %vm1397_vm12, %v1382_v15, %v1006_v59 }
 0x13e   : > { %v1421_v17 = vsel %vm1397_vm12, %v1384_v49, %v1008_v16 }
 0x140   : > { %v1123_v21 = vpop.permute.xlu0 %1122 }
 0x141   : > { %v1125_v33 = vpop.permute.xlu1 %1124  ;;  %v1456_v55 = vsel %vm1434_vm13, %v1419_v13, %v1123_v21 }
 0x142   : > { %v1458_v39 = vsel %vm1434_vm13, %v1421_v17, %v1125_v33 }
 0x144   : > { %v1197_v27 = vpop.permute.xlu0 %1196 }
 0x145   : > { %v667_v1 = vpop.permute.xlu1 %666  ;;  %v1493_v20 = vsel %vm1471_vm14, %v1456_v55, %v1197_v27 }
 0x146   : > { %2654 = vmatprep.mubr.msk.bf16.mxu0 %vm1535_vm15, %v1493_v20  ;;  %v1238_v40 = vsel %vm1212_vm7, %v3227_v43, %v667_v1 }
 0x148   : > { %v1199_v28 = vpop.permute.xlu0 %1198 }
 0x149   : > { %v669_v11 = vpop.permute.xlu1 %668  ;;  %v1495_v50 = vsel %vm1471_vm14, %v1458_v39, %v1199_v28 }
 0x14a   : > { %2655 = vmatmul.mubr.msk.bf16.gmra.mrb[20].mxu0 %vm1535_vm15, %v1495_v50  ;;  %v1240_v54 = vsel %vm1212_vm7, %v3303_v24, %v669_v11 }
 0x14c   : > { %v741_v14 = vpop.permute.xlu0 %740 }
 0x14d   : > { %v743_v9 = vpop.permute.xlu1 %742  ;;  %v1275_v35 = vsel %vm1249_vm8, %v1238_v40, %v741_v14 }
 0x14e   : > { %v1277_v31 = vsel %vm1249_vm8, %v1240_v54, %v743_v9 }
 0x150   : > { %v779_v61 = vpop.permute.xlu0 %778 }
 0x151   : > { %v781_v36 = vpop.permute.xlu1 %780  ;;  %v1312_v47 = vsel %vm1286_vm9, %v1275_v35, %v779_v61 }
 0x152   : > { %v1314_v26 = vsel %vm1286_vm9, %v1277_v31, %v781_v36 }
 0x154   : > { %v898_v34 = vpop.permute.xlu0 %897 }
 0x155   : > { %v900_v22 = vpop.permute.xlu1 %899  ;;  %v1349_v48 = vsel %vm1323_vm10, %v1312_v47, %v898_v34 }
 0x156   : > { %v1351_v58 = vsel %vm1323_vm10, %v1314_v26, %v900_v22 }
 0x158   : > { %v972_v29 = vpop.permute.xlu0 %971 }
 0x159   : > { %v974_v45 = vpop.permute.xlu1 %973  ;;  %v1386_v60 = vsel %vm1360_vm11, %v1349_v48, %v972_v29 }
 0x15a   : > { %v1388_v41 = vsel %vm1360_vm11, %v1351_v58, %v974_v45 }
 0x15c   : > { %v1010_v3 = vpop.permute.xlu0 %1009 }
 0x15d   : > { %v1012_v52 = vpop.permute.xlu1 %1011  ;;  %v1423_v32 = vsel %vm1397_vm12, %v1386_v60, %v1010_v3 }
 0x15e   : > { %v1425_v24 = vsel %vm1397_vm12, %v1388_v41, %v1012_v52 }
 0x160   : > { %v1127_v51 = vpop.permute.xlu0 %1126 }
 0x161   : > { %v1129_v2 = vpop.permute.xlu1 %1128  ;;  %v1460_v43 = vsel %vm1434_vm13, %v1423_v32, %v1127_v51 }
 0x162   : > { %v1462_v42 = vsel %vm1434_vm13, %v1425_v24, %v1129_v2 }
 0x164   : > { %v1201_v57 = vpop.permute.xlu0 %1200 }
 0x165   : > { %v671_v10 = vpop.permute.xlu1 %670  ;;  %v1497_v4 = vsel %vm1471_vm14, %v1460_v43, %v1201_v57 }
 0x166   : > { %2658 = vmatprep.mubr.msk.bf16.mxu0 %vm1535_vm15, %v1497_v4  ;;  %v1242_v18 = vsel %vm1212_vm7, %v3341_v12, %v671_v10 }
 0x168   : > { %v1203_v44 = vpop.permute.xlu0 %1202 }
 0x169   : > { %v673_v37 = vpop.permute.xlu1 %672  ;;  %v1499_v23 = vsel %vm1471_vm14, %v1462_v42, %v1203_v44 }
 0x16a   : > { %2659 = vmatmul.mubr.msk.bf16.gmra.mrb[24].mxu0 %vm1535_vm15, %v1499_v23  ;;  %v1244_v12 = vsel %vm1212_vm7, %v3422_v56, %v673_v37 }
 0x16c   : > { %v745_v53 = vpop.permute.xlu0 %744 }
 0x16d   : > { %v747_v30 = vpop.permute.xlu1 %746  ;;  %v1279_v13 = vsel %vm1249_vm8, %v1242_v18, %v745_v53 }
 0x16e   : > { %v1281_v14 = vsel %vm1249_vm8, %v1244_v12, %v747_v30 }
 0x170   : > { %v783_v8 = vpop.permute.xlu0 %782 }
 0x171   : > { %v785_v59 = vpop.permute.xlu1 %784  ;;  %v1316_v27 = vsel %vm1286_vm9, %v1279_v13, %v783_v8 }
 0x172   : > { %v1318_v34 = vsel %vm1286_vm9, %v1281_v14, %v785_v59 }
 0x174   : > { %v902_v16 = vpop.permute.xlu0 %901 }
 0x175   : > { %v904_v25 = vpop.permute.xlu1 %903  ;;  %v1353_v49 = vsel %vm1323_vm10, %v1316_v27, %v902_v16 }
 0x176   : > { %v1355_v3 = vsel %vm1323_vm10, %v1318_v34, %v904_v25 }
 0x178   : > { %v976_v63 = vpop.permute.xlu0 %975 }
 0x179   : > { %v978_v38 = vpop.permute.xlu1 %977  ;;  %v1390_v28 = vsel %vm1360_vm11, %v1353_v49, %v976_v63 }
 0x17a   : > { %v1392_v35 = vsel %vm1360_vm11, %v1355_v3, %v978_v38 }
 0x17c   : > { %v1014_v21 = vpop.permute.xlu0 %1013 }
 0x17d   : > { %v1016_v62 = vpop.permute.xlu1 %1015  ;;  %v2636_v33 = vpop.f32.mrb[0].mxu0  ;;  %v1427_v9 = vsel %vm1397_vm12, %v1390_v28, %v1014_v21 }
 0x17e   : > { %v1619_v15 = vadd.f32 %v2636_v33, %v3785_v46  ;;  %v1610_v19 = vpop.f32.mrb[1].mxu0  ;;  %v1429_v47 = vsel %vm1397_vm12, %v1392_v35, %v1016_v62 }
 0x17f   : > { %v1611_v0 = vadd.f32 %v3785_v46, %v1610_v19  ;;  %v2637_v55 = vpop.f32.mrb[2].mxu0 }
 0x180   : > { %v1622_v6 = vadd.f32 %v2637_v55, %v3785_v46  ;;  %v1613_v1 = vpop.f32.mrb[3].mxu0  ;;  %v1131_v20 = vpop.permute.xlu0 %1130  ;;  %v1755_v11 = vmax.f32 %v1619_v15, 0.0 }
 0x181   : > { %v1133_v17 = vpop.permute.xlu1 %1132  ;;  %v1614_v39 = vadd.f32 %v3785_v46, %v1613_v1  ;;  %v1753_v61 = vmax.f32 %v1611_v0, 0.0  ;;  %v1464_v29 = vsel %vm1434_vm13, %v1427_v9, %v1131_v20 }
 0x182   : > { %v1756_v50 = vmax.f32 %v1622_v6, 0.0  ;;  %v1466_v51 = vsel %vm1434_vm13, %v1429_v47, %v1133_v17 }
 0x183   : > { %v1754_v36 = vmax.f32 %v1614_v39, 0.0 }
 0x184   : > { %v1790_v22 = vpack.c.bf16 %v1756_v50, %v1755_v11  ;;  %v1205_v45 = vpop.permute.xlu0 %1204 }
 0x185   : > { %v675_v52 = vpop.permute.xlu1 %674  ;;  %v1501_v56 = vsel %vm1471_vm14, %v1464_v29, %v1205_v45  ;;  %v1789_v40 = vpack.c.bf16 %v1754_v36, %v1753_v61 }
 0x186   : > { %2662 = vmatprep.mubr.msk.bf16.mxu0 %vm1535_vm15, %v1501_v56  ;;  %v1246_v42 = vsel %vm1212_vm7, %v3460_v5, %v675_v52 }
 0x187   : > { %2672 = vmatprep.mubr.msk.bf16.mxu1 %vm1212_vm7, %v1789_v40 }
 0x188   : > { %2673 = vmatmul.mubr.msk.bf16.vlgmr.msra.gmra.mrb[0].mxu1 %vm1212_vm7, %v1790_v22  ;;  %v1207_v48 = vpop.permute.xlu0 %1206 }
 0x189   : > { %v677_v2 = vpop.permute.xlu1 %676  ;;  %v1503_v54 = vsel %vm1471_vm14, %v1466_v51, %v1207_v48 }
 0x18a   : > { %2663 = vmatmul.mubr.msk.bf16.gmra.mrb[28].mxu0 %vm1535_vm15, %v1503_v54  ;;  %v1248_v23 = vsel %vm1212_vm7, %v3541_v7, %v677_v2 }
 0x18c   : > { %v749_v60 = vpop.permute.xlu0 %748 }
 0x18d   : > { %v751_v31 = vpop.permute.xlu1 %750  ;;  %v1283_v53 = vsel %vm1249_vm8, %v1246_v42, %v749_v60 }
 0x18e   : > { %v1285_v59 = vsel %vm1249_vm8, %v1248_v23, %v751_v31 }
 0x190   : > { %v787_v32 = vpop.permute.xlu0 %786 }
 0x191   : > { %v789_v26 = vpop.permute.xlu1 %788  ;;  %v1320_v16 = vsel %vm1286_vm9, %v1283_v53, %v787_v32 }
 0x192   : > { %v1322_v5 = vsel %vm1286_vm9, %v1285_v59, %v789_v26 }
 0x194   : > { %v906_v43 = vpop.permute.xlu0 %905 }
 0x195   : > { %v908_v57 = vpop.permute.xlu1 %907  ;;  %v1357_v21 = vsel %vm1323_vm10, %v1320_v16, %v906_v43 }
 0x196   : > { %v1359_v33 = vsel %vm1323_vm10, %v1322_v5, %v908_v57 }
 0x198   : > { %v980_v58 = vpop.permute.xlu0 %979 }
 0x199   : > { %v982_v10 = vpop.permute.xlu1 %981  ;;  %v1394_v18 = vsel %vm1360_vm11, %v1357_v21, %v980_v58 }
 0x19a   : > { %v1396_v13 = vsel %vm1360_vm11, %v1359_v33, %v982_v10 }
 0x19c   : > { %v1018_v4 = vpop.permute.xlu0 %1017 }
 0x19d   : > { %v1020_v41 = vpop.permute.xlu1 %1019  ;;  %v2640_v24 = vpop.f32.mrb[4].mxu0  ;;  %v1431_v0 = vsel %vm1397_vm12, %v1394_v18, %v1018_v4 }
 0x19e   : > { %v1635_v44 = vadd.f32 %v2640_v24, %v3785_v46  ;;  %v1626_v37 = vpop.f32.mrb[5].mxu0  ;;  %v1433_v6 = vsel %vm1397_vm12, %v1396_v13, %v1020_v41 }
 0x19f   : > { %v1627_v30 = vadd.f32 %v3785_v46, %v1626_v37  ;;  %v2641_v8 = vpop.f32.mrb[6].mxu0 }
 0x1a0   : > { %v1638_v25 = vadd.f32 %v2641_v8, %v3785_v46  ;;  %v1629_v63 = vpop.f32.mrb[7].mxu0  ;;  %v1135_v38 = vpop.permute.xlu0 %1134  ;;  %v1759_v15 = vmax.f32 %v1635_v44, 0.0 }
 0x1a1   : > { %v1137_v62 = vpop.permute.xlu1 %1136  ;;  %v1630_v7 = vadd.f32 %v3785_v46, %v1629_v63  ;;  %v1757_v55 = vmax.f32 %v1627_v30, 0.0  ;;  %v1468_v20 = vsel %vm1434_vm13, %v1431_v0, %v1135_v38 }
 0x1a2   : > { %v1760_v19 = vmax.f32 %v1638_v25, 0.0  ;;  %v1470_v17 = vsel %vm1434_vm13, %v1433_v6, %v1137_v62 }
 0x1a3   : > { %v1758_v27 = vmax.f32 %v1630_v7, 0.0 }
 0x1a4   : > { %v1792_v1 = vpack.c.bf16 %v1760_v19, %v1759_v15  ;;  %v1209_v49 = vpop.permute.xlu0 %1208 }
 0x1a5   : > { %v1791_v39 = vpack.c.bf16 %v1758_v27, %v1757_v55  ;;  %v1211_v12 = vpop.permute.xlu1 %1210  ;;  %v1505_v28 = vsel %vm1471_vm14, %v1468_v20, %v1209_v49 }
 0x1a6   : > { %v1507_v11 = vsel %vm1471_vm14, %v1470_v17, %v1211_v12  ;;  %2666 = vmatprep.mubr.msk.bf16.mxu0 %vm1535_vm15, %v1505_v28 }
 0x1a7   : > { %2667 = vmatmul.mubr.msk.bf16.gmra.mrb[32].mxu0 %vm1535_vm15, %v1507_v11  ;;  %2676 = vmatprep.mubr.msk.bf16.mxu1 %vm1212_vm7, %v1791_v39 }
 0x1a8   : > { %2677 = vmatmul.mubr.msk.bf16.gmra.mrb[4].mxu1 %vm1212_vm7, %v1792_v1 }
 0x1bd   : > { %v2644_v50 = vpop.f32.mrb[8].mxu0 }
 0x1be   : > { %v1651_v14 = vadd.f32 %v2644_v50, %v3785_v46  ;;  %v1642_v9 = vpop.f32.mrb[9].mxu0 }
 0x1bf   : > { %v1643_v61 = vadd.f32 %v3785_v46, %v1642_v9  ;;  %v2645_v36 = vpop.f32.mrb[10].mxu0 }
 0x1c0   : > { %v1654_v34 = vadd.f32 %v2645_v36, %v3785_v46  ;;  %v1645_v22 = vpop.f32.mrb[11].mxu0  ;;  %v1763_v45 = vmax.f32 %v1651_v14, 0.0 }
 0x1c1   : > { %v1646_v29 = vadd.f32 %v3785_v46, %v1645_v22  ;;  %v1761_v52 = vmax.f32 %v1643_v61, 0.0 }
 0x1c2   : > { %v1764_v3 = vmax.f32 %v1654_v34, 0.0 }
 0x1c3   : > { %v1762_v56 = vmax.f32 %v1646_v29, 0.0 }
 0x1c4   : > { %v1794_v40 = vpack.c.bf16 %v1764_v3, %v1763_v45  ;;  %v3872_v45 = vld [vmem:[%s3960_s5] ss:$0 sm:$0xff] }
 0x1c5   : > { %v1793_v35 = vpack.c.bf16 %v1762_v56, %v1761_v52 }
 0x1c7   : > { %2680 = vmatprep.mubr.msk.bf16.mxu1 %vm1212_vm7, %v1793_v35 }
 0x1c8   : > { %2681 = vmatmul.mubr.msk.bf16.gmra.mrb[8].mxu1 %vm1212_vm7, %v1794_v40 }
 0x1dd   : > { %v2648_v47 = vpop.f32.mrb[12].mxu0 }
 0x1de   : > { %v1667_v51 = vadd.f32 %v2648_v47, %v3785_v46  ;;  %v1658_v48 = vpop.f32.mrb[13].mxu0 }
 0x1df   : > { %v1659_v2 = vadd.f32 %v3785_v46, %v1658_v48  ;;  %v2649_v54 = vpop.f32.mrb[14].mxu0 }
 0x1e0   : > { %v1670_v60 = vadd.f32 %v2649_v54, %v3785_v46  ;;  %v1661_v31 = vpop.f32.mrb[15].mxu0  ;;  %v1767_v26 = vmax.f32 %v1667_v51, 0.0 }
 0x1e1   : > { %v1662_v32 = vadd.f32 %v3785_v46, %v1661_v31  ;;  %v1765_v57 = vmax.f32 %v1659_v2, 0.0 }
 0x1e2   : > { %v1768_v43 = vmax.f32 %v1670_v60, 0.0 }
 0x1e3   : > { %v1766_v58 = vmax.f32 %v1662_v32, 0.0 }
 0x1e4   : > { %v1796_v10 = vpack.c.bf16 %v1768_v43, %v1767_v26 }
 0x1e5   : > { %v1795_v4 = vpack.c.bf16 %v1766_v58, %v1765_v57 }
 0x1e7   : > { %2684 = vmatprep.mubr.msk.bf16.mxu1 %vm1212_vm7, %v1795_v4 }
 0x1e8   : > { %2685 = vmatmul.mubr.msk.bf16.gmra.mrb[12].mxu1 %vm1212_vm7, %v1796_v10 }
 0x1fd   : > { %v2652_v41 = vpop.f32.mrb[16].mxu0 }
 0x1fe   : > { %v1683_v24 = vadd.f32 %v2652_v41, %v3785_v46  ;;  %v1674_v42 = vpop.f32.mrb[17].mxu0 }
 0x1ff   : > { %v1675_v44 = vadd.f32 %v3785_v46, %v1674_v42  ;;  %v2653_v37 = vpop.f32.mrb[18].mxu0 }
 0x200   : > { %v1686_v23 = vadd.f32 %v2653_v37, %v3785_v46  ;;  %v1677_v53 = vpop.f32.mrb[19].mxu0  ;;  %v1771_v8 = vmax.f32 %v1683_v24, 0.0 }
 0x201   : > { %v1678_v30 = vadd.f32 %v3785_v46, %v1677_v53  ;;  %v1769_v16 = vmax.f32 %v1675_v44, 0.0 }
 0x202   : > { %v1772_v59 = vmax.f32 %v1686_v23, 0.0 }
 0x203   : > { %v1770_v25 = vmax.f32 %v1678_v30, 0.0 }
 0x204   : > { %v1798_v63 = vpack.c.bf16 %v1772_v59, %v1771_v8 }
 0x205   : > { %v1797_v38 = vpack.c.bf16 %v1770_v25, %v1769_v16 }
 0x207   : > { %2688 = vmatprep.mubr.msk.bf16.mxu1 %vm1212_vm7, %v1797_v38 }
 0x208   : > { %2689 = vmatmul.mubr.msk.bf16.gmra.mrb[16].mxu1 %vm1212_vm7, %v1798_v63 }
 0x21d   : > { %v2656_v5 = vpop.f32.mrb[20].mxu0 }
 0x21e   : > { %v1699_v21 = vadd.f32 %v2656_v5, %v3785_v46  ;;  %v1690_v62 = vpop.f32.mrb[21].mxu0 }
 0x21f   : > { %v1691_v7 = vadd.f32 %v3785_v46, %v1690_v62  ;;  %v2657_v33 = vpop.f32.mrb[22].mxu0 }
 0x220   : > { %v1702_v18 = vadd.f32 %v2657_v33, %v3785_v46  ;;  %v1693_v15 = vpop.f32.mrb[23].mxu0  ;;  %v1775_v13 = vmax.f32 %v1699_v21, 0.0 }
 0x221   : > { %v1694_v19 = vadd.f32 %v3785_v46, %v1693_v15  ;;  %v1773_v55 = vmax.f32 %v1691_v7, 0.0 }
 0x222   : > { %v1776_v0 = vmax.f32 %v1702_v18, 0.0 }
 0x223   : > { %v1774_v27 = vmax.f32 %v1694_v19, 0.0 }
 0x224   : > { %v1800_v6 = vpack.c.bf16 %v1776_v0, %v1775_v13 }
 0x225   : > { %v1799_v1 = vpack.c.bf16 %v1774_v27, %v1773_v55 }
 0x227   : > { %2692 = vmatprep.mubr.msk.bf16.mxu1 %vm1212_vm7, %v1799_v1 }
 0x228   : > { %2693 = vmatmul.mubr.msk.bf16.gmra.mrb[20].mxu1 %vm1212_vm7, %v1800_v6 }
 0x23d   : > { %v2660_v20 = vpop.f32.mrb[24].mxu0 }
 0x23e   : > { %v1715_v49 = vadd.f32 %v2660_v20, %v3785_v46  ;;  %v1706_v17 = vpop.f32.mrb[25].mxu0 }
 0x23f   : > { %v1707_v39 = vadd.f32 %v3785_v46, %v1706_v17  ;;  %v2661_v12 = vpop.f32.mrb[26].mxu0 }
 0x240   : > { %v1718_v28 = vadd.f32 %v2661_v12, %v3785_v46  ;;  %v1709_v11 = vpop.f32.mrb[27].mxu0  ;;  %v1779_v14 = vmax.f32 %v1715_v49, 0.0 }
 0x241   : > { %v1710_v50 = vadd.f32 %v3785_v46, %v1709_v11  ;;  %v1777_v61 = vmax.f32 %v1707_v39, 0.0 }
 0x242   : > { %v1780_v9 = vmax.f32 %v1718_v28, 0.0 }
 0x243   : > { %v1778_v36 = vmax.f32 %v1710_v50, 0.0 }
 0x244   : > { %v1802_v34 = vpack.c.bf16 %v1780_v9, %v1779_v14 }
 0x245   : > { %v1801_v22 = vpack.c.bf16 %v1778_v36, %v1777_v61 }
 0x247   : > { %2696 = vmatprep.mubr.msk.bf16.mxu1 %vm1212_vm7, %v1801_v22 }
 0x248   : > { %2697 = vmatmul.mubr.msk.bf16.gmra.mrb[24].mxu1 %vm1212_vm7, %v1802_v34 }
 0x25b   : > { %v2674_v29 = vpop.f32.mrb[0].mxu1 }
 0x25c   : > { %v1906_v3 = vpop.f32.mrb[1].mxu1  ;;  %v1915_v40 = vadd.f32 %v2674_v29, %v3872_v45 }
 0x25d   : > { %v2664_v52 = vpop.f32.mrb[28].mxu0  ;;  %v2675_v56 = vpop.f32.mrb[2].mxu1  ;;  %v1907_v2 = vadd.f32 %v3872_v45, %v1906_v3 }
 0x25e   : > { %v1731_v35 = vadd.f32 %v2664_v52, %v3785_v46  ;;  %v1918_v47 = vadd.f32 %v2675_v56, %v3872_v45  ;;  %v1722_v51 = vpop.f32.mrb[29].mxu0  ;;  %v1909_v48 = vpop.f32.mrb[3].mxu1 }
 0x25f   : > { %v1723_v54 = vadd.f32 %v3785_v46, %v1722_v51  ;;  %v1910_v60 = vadd.f32 %v3872_v45, %v1909_v48  ;;  %v2665_v31 = vpop.f32.mrb[30].mxu0 }
 0x260   : > { %v2489_v32 = vpack.c.bf16 %v1918_v47, %v1915_v40  ;;  %v1734_v26 = vadd.f32 %v2665_v31, %v3785_v46  ;;  %v1725_v43 = vpop.f32.mrb[31].mxu0  ;;  %v1783_v10 = vmax.f32 %v1731_v35, 0.0 }
 0x261   : > { %v2484_v57 = vpack.c.bf16 %v1910_v60, %v1907_v2  ;;  %v1726_v58 = vadd.f32 %v3785_v46, %v1725_v43  ;;  %v1781_v41 = vmax.f32 %v1723_v54, 0.0 }
 0x262   : > { %2571 = vst [vmem:[%s3882_s12 + $0x8] sm:$0xff] %v2489_v32   ;;  %v1784_v4 = vmax.f32 %v1734_v26, 0.0 }
 0x263   : > { %2485 = vst [vmem:[%s3882_s12] sm:$0xff] %v2484_v57   ;;  %v1782_v24 = vmax.f32 %v1726_v58, 0.0 }
 0x264   : > { %v1804_v42 = vpack.c.bf16 %v1784_v4, %v1783_v10 }
 0x265   : > { %v1803_v44 = vpack.c.bf16 %v1782_v24, %v1781_v41 }
 0x267   : > { %2700 = vmatprep.mubr.msk.bf16.mxu1 %vm1212_vm7, %v1803_v44 }
 0x268   : > { %2701 = vmatmul.mubr.msk.bf16.gmra.mrb[28].mxu1 %vm1212_vm7, %v1804_v42 }
 0x27a   : > { %v2668_v37 = vpop.f32.mrb[32].mxu0 }
 0x27b   : > { %v1747_v23 = vadd.f32 %v2668_v37, %v3785_v46  ;;  %v1738_v53 = vpop.f32.mrb[33].mxu0  ;;  %v2678_v30 = vpop.f32.mrb[4].mxu1 }
 0x27c   : > { %v1739_v8 = vadd.f32 %v3785_v46, %v1738_v53  ;;  %v2669_v59 = vpop.f32.mrb[34].mxu0  ;;  %v1922_v16 = vpop.f32.mrb[5].mxu1  ;;  %v1931_v5 = vadd.f32 %v2678_v30, %v3872_v45 }
 0x27d   : > { %v1750_v25 = vadd.f32 %v2669_v59, %v3785_v46  ;;  %v1741_v63 = vpop.f32.mrb[35].mxu0  ;;  %v2679_v38 = vpop.f32.mrb[6].mxu1  ;;  %v1787_v33 = vmax.f32 %v1747_v23, 0.0  ;;  %v1923_v15 = vadd.f32 %v3872_v45, %v1922_v16 }
 0x27e   : > { %v1742_v21 = vadd.f32 %v3785_v46, %v1741_v63  ;;  %v1934_v62 = vadd.f32 %v2679_v38, %v3872_v45  ;;  %v1925_v7 = vpop.f32.mrb[7].mxu1  ;;  %v1785_v13 = vmax.f32 %v1739_v8, 0.0 }
 0x27f   : > { %v1788_v18 = vmax.f32 %v1750_v25, 0.0  ;;  %v1926_v19 = vadd.f32 %v3872_v45, %v1925_v7 }
 0x280   : > { %v1786_v0 = vmax.f32 %v1742_v21, 0.0  ;;  %v2499_v55 = vpack.c.bf16 %v1934_v62, %v1931_v5 }
 0x281   : > { %v1806_v27 = vpack.c.bf16 %v1788_v18, %v1787_v33  ;;  %v2494_v6 = vpack.c.bf16 %v1926_v19, %v1923_v15 }
 0x282   : > { %v1805_v1 = vpack.c.bf16 %v1786_v0, %v1785_v13  ;;  %2573 = vst [vmem:[%s3882_s12 + $0x18] sm:$0xff] %v2499_v55  }
 0x283   : > { %2572 = vst [vmem:[%s3882_s12 + $0x10] sm:$0xff] %v2494_v6  }
 0x284   : > { %2704 = vmatprep.mubr.msk.bf16.mxu1 %vm1212_vm7, %v1805_v1 }
 0x285   : > { %2705 = vmatmul.mubr.msk.bf16.gmra.mrb[32].mxu1 %vm1212_vm7, %v1806_v27 }
 0x29b   : > { %v2682_v46 = vpop.f32.mrb[8].mxu1 }
 0x29c   : > { %v1938_v20 = vpop.f32.mrb[9].mxu1  ;;  %v1947_v17 = vadd.f32 %v2682_v46, %v3872_v45 }
 0x29d   : > { %v2683_v49 = vpop.f32.mrb[10].mxu1  ;;  %v1939_v28 = vadd.f32 %v3872_v45, %v1938_v20 }
 0x29e   : > { %v1950_v39 = vadd.f32 %v2683_v49, %v3872_v45  ;;  %v1941_v12 = vpop.f32.mrb[11].mxu1 }
 0x29f   : > { %v1942_v11 = vadd.f32 %v3872_v45, %v1941_v12 }
 0x2a0   : > { %v2509_v50 = vpack.c.bf16 %v1950_v39, %v1947_v17 }
 0x2a1   : > { %v2504_v14 = vpack.c.bf16 %v1942_v11, %v1939_v28 }
 0x2a2   : > { %2575 = vst [vmem:[%s3882_s12 + $0x28] sm:$0xff] %v2509_v50  }
 0x2a3   : > { %2574 = vst [vmem:[%s3882_s12 + $0x20] sm:$0xff] %v2504_v14  }
 0x2bb   : > { %v2686_v9 = vpop.f32.mrb[12].mxu1 }
 0x2bc   : > { %v1954_v61 = vpop.f32.mrb[13].mxu1  ;;  %v1963_v34 = vadd.f32 %v2686_v9, %v3872_v45 }
 0x2bd   : > { %v2687_v36 = vpop.f32.mrb[14].mxu1  ;;  %v1955_v3 = vadd.f32 %v3872_v45, %v1954_v61 }
 0x2be   : > { %v1966_v22 = vadd.f32 %v2687_v36, %v3872_v45  ;;  %v1957_v29 = vpop.f32.mrb[15].mxu1 }
 0x2bf   : > { %v1958_v52 = vadd.f32 %v3872_v45, %v1957_v29 }
 0x2c0   : > { %v2519_v56 = vpack.c.bf16 %v1966_v22, %v1963_v34 }
 0x2c1   : > { %v2514_v40 = vpack.c.bf16 %v1958_v52, %v1955_v3 }
 0x2c2   : > { %2577 = vst [vmem:[%s3882_s12 + $0x38] sm:$0xff] %v2519_v56  }
 0x2c3   : > { %2576 = vst [vmem:[%s3882_s12 + $0x30] sm:$0xff] %v2514_v40  }
 0x2db   : > { %v2690_v35 = vpop.f32.mrb[16].mxu1 }
 0x2dc   : > { %v1970_v47 = vpop.f32.mrb[17].mxu1  ;;  %v1979_v48 = vadd.f32 %v2690_v35, %v3872_v45 }
 0x2dd   : > { %v2691_v51 = vpop.f32.mrb[18].mxu1  ;;  %v1971_v60 = vadd.f32 %v3872_v45, %v1970_v47 }
 0x2de   : > { %v1982_v2 = vadd.f32 %v2691_v51, %v3872_v45  ;;  %v1973_v54 = vpop.f32.mrb[19].mxu1 }
 0x2df   : > { %v1974_v31 = vadd.f32 %v3872_v45, %v1973_v54 }
 0x2e0   : > { %v2529_v32 = vpack.c.bf16 %v1982_v2, %v1979_v48 }
 0x2e1   : > { %v2524_v26 = vpack.c.bf16 %v1974_v31, %v1971_v60 }
 0x2e2   : > { %2579 = vst [vmem:[%s3882_s12 + $0x48] sm:$0xff] %v2529_v32  }
 0x2e3   : > { %2578 = vst [vmem:[%s3882_s12 + $0x40] sm:$0xff] %v2524_v26  }
 0x2fb   : > { %v2694_v43 = vpop.f32.mrb[20].mxu1 }
 0x2fc   : > { %v1986_v57 = vpop.f32.mrb[21].mxu1  ;;  %v1995_v10 = vadd.f32 %v2694_v43, %v3872_v45 }
 0x2fd   : > { %v2695_v58 = vpop.f32.mrb[22].mxu1  ;;  %v1987_v24 = vadd.f32 %v3872_v45, %v1986_v57 }
 0x2fe   : > { %v1998_v4 = vadd.f32 %v2695_v58, %v3872_v45  ;;  %v1989_v41 = vpop.f32.mrb[23].mxu1 }
 0x2ff   : > { %v1990_v42 = vadd.f32 %v3872_v45, %v1989_v41 }
 0x300   : > { %v2539_v44 = vpack.c.bf16 %v1998_v4, %v1995_v10 }
 0x301   : > { %v2534_v37 = vpack.c.bf16 %v1990_v42, %v1987_v24 }
 0x302   : > { %2581 = vst [vmem:[%s3882_s12 + $0x58] sm:$0xff] %v2539_v44  }
 0x303   : > { %2580 = vst [vmem:[%s3882_s12 + $0x50] sm:$0xff] %v2534_v37  }
 0x31b   : > { %v2698_v23 = vpop.f32.mrb[24].mxu1 }
 0x31c   : > { %v2002_v53 = vpop.f32.mrb[25].mxu1  ;;  %v2011_v8 = vadd.f32 %v2698_v23, %v3872_v45 }
 0x31d   : > { %v2699_v30 = vpop.f32.mrb[26].mxu1  ;;  %v2003_v25 = vadd.f32 %v3872_v45, %v2002_v53 }
 0x31e   : > { %v2014_v59 = vadd.f32 %v2699_v30, %v3872_v45  ;;  %v2005_v16 = vpop.f32.mrb[27].mxu1 }
 0x31f   : > { %v2006_v63 = vadd.f32 %v3872_v45, %v2005_v16 }
 0x320   : > { %v2549_v38 = vpack.c.bf16 %v2014_v59, %v2011_v8 }
 0x321   : > { %v2544_v5 = vpack.c.bf16 %v2006_v63, %v2003_v25 }
 0x322   : > { %2583 = vst [vmem:[%s3882_s12 + $0x68] sm:$0xff] %v2549_v38  }
 0x323   : > { %2582 = vst [vmem:[%s3882_s12 + $0x60] sm:$0xff] %v2544_v5  }
 0x33b   : > { %v2702_v21 = vpop.f32.mrb[28].mxu1 }
 0x33c   : > { %v2018_v62 = vpop.f32.mrb[29].mxu1  ;;  %v2027_v33 = vadd.f32 %v2702_v21, %v3872_v45 }
 0x33d   : > { %v2703_v7 = vpop.f32.mrb[30].mxu1  ;;  %v2019_v19 = vadd.f32 %v3872_v45, %v2018_v62 }
 0x33e   : > { %v2030_v18 = vadd.f32 %v2703_v7, %v3872_v45  ;;  %v2021_v15 = vpop.f32.mrb[31].mxu1 }
 0x33f   : > { %v2022_v13 = vadd.f32 %v3872_v45, %v2021_v15 }
 0x340   : > { %v2559_v0 = vpack.c.bf16 %v2030_v18, %v2027_v33 }
 0x341   : > { %v2554_v55 = vpack.c.bf16 %v2022_v13, %v2019_v19 }
 0x342   : > { %2585 = vst [vmem:[%s3882_s12 + $0x78] sm:$0xff] %v2559_v0  }
 0x343   : > { %2584 = vst [vmem:[%s3882_s12 + $0x70] sm:$0xff] %v2554_v55  }
 0x358   : > { %v2706_v27 = vpop.f32.mrb[32].mxu1 }
 0x359   : > { %v2034_v6 = vpop.f32.mrb[33].mxu1  ;;  %v2043_v46 = vadd.f32 %v2706_v27, %v3872_v45 }
 0x35a   : > { %v2707_v1 = vpop.f32.mrb[34].mxu1  ;;  %v2035_v17 = vadd.f32 %v3872_v45, %v2034_v6 }
 0x35b   : > { %v2046_v20 = vadd.f32 %v2707_v1, %v3872_v45  ;;  %v2037_v49 = vpop.f32.mrb[35].mxu1 }
 0x35c   : > { %v2038_v39 = vadd.f32 %v3872_v45, %v2037_v49 }
 0x35d   : > { %v2569_v12 = vpack.c.bf16 %v2046_v20, %v2043_v46 }
 0x35e   : > { %v2564_v28 = vpack.c.bf16 %v2038_v39, %v2035_v17 }
 0x35f   : > { %2587 = vst [vmem:[%s3882_s12 + $0x88] sm:$0xff] %v2569_v12  }
 0x360   : > { %2586 = vst [vmem:[%s3882_s12 + $0x80] sm:$0xff] %v2564_v28  }
 0x361 PF: > { %s16_s23 = sadd.s32 1, %s2792_s23   ;;  %s3962_s21 = smov %s2788_s22 }
 0x362   : > { %p13_p5 = scmp.ge.s32.totalorder %s16_s23, 4   ;;  %s3963_s22 = smov %s3965_s24 }
 0x364   :  { %15 = sbr.rel (!%p13_p5) target bundleno = 2 (0x2), region = 77 }

</bundles_post_ra>
